<compile_context>
chip_gen: v6e
topology: v6e:2x2x1
jax: 0.10.0
libtpu: 0.0.40
codegen_flags: <defaults>
</compile_context>

<pallas_src>
import functools

import jax
import jax.numpy as jnp
from jax.experimental import pallas as pl
from jax.experimental.pallas import tpu as pltpu


def _round_up(x, m):
    return ((x + m - 1) // m) * m


# ----------------------------- Pallas kernel ------------------------------ #

def _cbow_kernel(num_layers, seq, idx_ref, emb_ref, *rest):
    """Refs (in order): idx (SMEM, (B*seq,) i32), emb (VMEM f32 (vocab_p, emb_p)),
    w1, b1, ..., wL, bL (VMEM), out (VMEM f32 (TB, C_pad)), bag scratch (VMEM f32)."""
    *params, out_ref, bag_ref = rest
    assert len(params) == 2 * num_layers

    tb = out_ref.shape[0]            # batch tile (multiple of 8 sublanes)
    base = pl.program_id(0) * tb     # first global sentence row of this tile

    # ---- embedding bag -------------------------------------------------------
    # Token ids live on the scalar path (SMEM); each id selects a dynamic
    # (1, emb_p) f32 row of the VMEM table.  Per sentence the seq rows are
    # tree-summed (dependency depth log2(seq)), and the bag is written in full
    # (8, emb_p) sublane chunks (lane- and sublane-dense stores, no vst.msk).
    for ci in range(tb // 8):
        rows = []
        for bi in range(8):
            b = base + ci * 8 + bi
            vals = [emb_ref[pl.ds(idx_ref[b * seq + s], 1), :] for s in range(seq)]
            while len(vals) > 1:                       # pairwise tree reduction
                nxt = [vals[k] + vals[k + 1] for k in range(0, len(vals) - 1, 2)]
                if len(vals) % 2:
                    nxt.append(vals[-1])
                vals = nxt
            rows.append(vals[0])
        bag_ref[ci * 8:(ci + 1) * 8, :] = jnp.concatenate(rows, axis=0)

    # ---- MLP: Linear (+ReLU) stack; bf16 MXU matmuls, f32 accumulation ------
    h = bag_ref[...]                                   # (tb, emb_p) f32
    for i in range(num_layers):
        w = params[2 * i][...]                         # (in_p, out_p) bf16
        b = params[2 * i + 1][...]                     # (1, out_p)    f32
        h = jnp.dot(h.astype(w.dtype), w,
                    preferred_element_type=jnp.float32) + b
        if i < num_layers - 1:
            h = jnp.maximum(h, 0.0)                    # activation_function = ReLU

    # ---- LogSoftmax ----------------------------------------------------------
    # Padded class lanes already carry a -1e30 bias (baked in at prepare time),
    # so no iota/where mask is needed here.
    m = jnp.max(h, axis=-1, keepdims=True)
    z = h - m
    lse = jnp.log(jnp.sum(jnp.exp(z), axis=-1, keepdims=True))
    out_ref[...] = (z - lse).astype(out_ref.dtype)


# ------------------------- one-time parameter prep ------------------------- #

def prepare_cbow_params(embeddings, weights, biases):
    """f32 gather table, bf16 MXU weights, f32 biases; all feature dims padded
    to 128 lanes.  Final-layer padded bias lanes are poisoned with -1e30 so the
    kernel's log-softmax ignores padded classes without an explicit mask."""
    vocab, emb_dim = embeddings.shape
    vocab_p = _round_up(vocab, 8)          # f32 sublane tile is 8
    emb_p = _round_up(emb_dim, 128)

    emb_pad = jnp.zeros((vocab_p, emb_p), jnp.float32).at[:vocab, :emb_dim].set(
        embeddings.astype(jnp.float32))

    num_layers = len(weights)
    flat, dims = [], []
    prev_p = emb_p
    for i, (w, b) in enumerate(zip(weights, biases)):
        in_d, out_d = w.shape
        out_p = _round_up(out_d, 128)
        w_pad = jnp.zeros((prev_p, out_p), jnp.bfloat16).at[:in_d, :out_d].set(
            w.astype(jnp.bfloat16))
        # Only the last layer (no ReLU after it) gets -1e30 in its padded lanes.
        fill = -1e30 if i == num_layers - 1 else 0.0
        b_pad = jnp.full((1, out_p), fill, jnp.float32).at[0, :out_d].set(
            b.astype(jnp.float32))
        flat += [w_pad, b_pad]
        dims.append((prev_p, out_p))
        prev_p = out_p

    meta = dict(num_layers=num_layers, num_classes=weights[-1].shape[1],
                emb_p=emb_p, layer_dims=tuple(dims), classes_p=dims[-1][1])
    return emb_pad, tuple(flat), meta


# ------------------------------ forward call -------------------------------- #

def cbow_forward(indices, emb_pad, flat_params, meta, *, block_b=None):
    """indices: (B, seq) int32, one row per sentence (= one module forward()).
    Returns (B, num_classes) f32 log-probabilities."""
    B, seq = indices.shape
    num_layers = meta["num_layers"]
    num_classes = meta["num_classes"]
    emb_p = meta["emb_p"]
    classes_p = meta["classes_p"]

    if block_b is None:
        # Single fat tile for small batches (v5e/v6e: one TensorCore, so one
        # grid step removes all per-step overhead).  On v7x pass
        # block_b = ceil(B/2) rounded to 8 to shard two tiles across its 2 TCs.
        block_b = min(_round_up(B, 8), 256)
    block_b = _round_up(block_b, 8)
    b_p = _round_up(B, block_b)

    idx = indices.astype(jnp.int32)
    if b_p != B:                      # pad batch; extra rows use token 0, sliced off
        idx = jnp.zeros((b_p, seq), jnp.int32).at[:B].set(idx)
    idx_flat = idx.reshape(-1)        # 1-D SMEM array: far gentler padding than (B, seq)

    # Whole (small) table + weights stay VMEM-resident; only the output is tiled.
    in_specs = [pl.BlockSpec(emb_pad.shape, lambda i, idx_ref: (0, 0))]
    for in_p, out_p in meta["layer_dims"]:
        in_specs.append(pl.BlockSpec((in_p, out_p), lambda i, idx_ref: (0, 0)))
        in_specs.append(pl.BlockSpec((1, out_p), lambda i, idx_ref: (0, 0)))
    # TODO(synk): for realistic vocab sizes (esp. v7x's 64 MiB VMEM) keep the
    # table in HBM (memory_space=pl.ANY) and DMA-gather only the seq*block_b
    # needed rows into a double-buffered VMEM scratch, overlapped with the MLP.

    kernel = functools.partial(_cbow_kernel, num_layers, seq)
    out = pl.pallas_call(
        kernel,
        out_shape=jax.ShapeDtypeStruct((b_p, classes_p), jnp.float32),
        grid_spec=pltpu.PrefetchScalarGridSpec(
            num_scalar_prefetch=1,                 # token indices -> SMEM
            grid=(b_p // block_b,),
            in_specs=in_specs,
            out_specs=pl.BlockSpec((block_b, classes_p),
                                   lambda i, idx_ref: (i, 0)),
            scratch_shapes=[pltpu.VMEM((block_b, emb_p), jnp.float32)],
        ),
        compiler_params=pltpu.CompilerParams(
            dimension_semantics=("parallel",),     # shard batch tiles (v7x 2 TCs)
            vmem_limit_bytes=32 * 1024 * 1024,
        ),
    )(idx_flat, emb_pad, *flat_params)

    return out[:B, :num_classes]


# ------------------------------ reference --------------------------------- #

def cbow_reference(indices, embeddings, weights, biases):
    """Same math as the module, mirroring the kernel's numerics
    (f32 embedding bag, bf16 matmul inputs with f32 accumulation)."""
    h = jnp.sum(embeddings[indices].astype(jnp.float32), axis=1)   # (B, emb)
    L = len(weights)
    for i, (w, b) in enumerate(zip(weights, biases)):
        h = jnp.dot(h.astype(jnp.bfloat16), w.astype(jnp.bfloat16),
                    preferred_element_type=jnp.float32) + b.reshape(1, -1)
        if i < L - 1:
            h = jnp.maximum(h, 0.0)
    return jax.nn.log_softmax(h, axis=-1)


# --------------------------------- main ------------------------------------ #

if __name__ == "__main__":
    VOCAB_SIZE = 128
    NUM_CLASSES = 16
    EMBEDDING_DIM = 32
    HIDDEN_DIM = 32
    NUM_HIDDEN_LAYERS = 3      # linear1->ReLU->linear2->ReLU->linear3->LogSoftmax
    SEQ_LEN = 8
    BATCH = 16                 # 16 sentences per call -> one (16, 128) tile, grid=(1,)
    UNK = 0

    key = jax.random.PRNGKey(0)
    k_emb, k_w, k_b = jax.random.split(key, 3)

    embeddings = jax.random.normal(k_emb, (VOCAB_SIZE, EMBEDDING_DIM), jnp.float32)

    layer_dims = []
    for i in range(1, NUM_HIDDEN_LAYERS + 1):
        if i == 1:
            layer_dims.append((EMBEDDING_DIM, HIDDEN_DIM))
        elif i == NUM_HIDDEN_LAYERS:
            layer_dims.append((HIDDEN_DIM, NUM_CLASSES))
        else:
            layer_dims.append((HIDDEN_DIM, HIDDEN_DIM))

    w_keys = jax.random.split(k_w, NUM_HIDDEN_LAYERS)
    b_keys = jax.random.split(k_b, NUM_HIDDEN_LAYERS)
    weights = [0.1 * jax.random.normal(w_keys[i], layer_dims[i], jnp.float32)
               for i in range(NUM_HIDDEN_LAYERS)]
    biases = [0.1 * jax.random.normal(b_keys[i], (layer_dims[i][1],), jnp.float32)
              for i in range(NUM_HIDDEN_LAYERS)]

    # Host-side glue: word -> index dictionary lookup (Python string handling).
    # Each row of the batch corresponds to one forward() call of the module.
    word_to_index = {f"word{i}": i for i in range(1, VOCAB_SIZE)}
    sentences = []
    for b in range(BATCH):
        sent = []
        for s in range(SEQ_LEN):
            wid = (7 * b + 13 * s + 1) % VOCAB_SIZE
            sent.append(f"word{wid}" if (b + s) % 5 else "not_in_vocab")
        sentences.append(sent)
    indices = jnp.array(
        [[word_to_index.get(w, UNK) for w in sent] for sent in sentences],
        dtype=jnp.int32)

    emb_pad, flat_params, meta = prepare_cbow_params(embeddings, weights, biases)
    out = cbow_forward(indices, emb_pad, flat_params, meta)
    out = jax.block_until_ready(out)

    ref = cbow_reference(indices, embeddings, weights, biases)

    assert out.shape == (BATCH, NUM_CLASSES), out.shape
    assert jnp.allclose(out, ref, atol=2e-3, rtol=2e-3), (out, ref)

    print("KERNEL_OK")
</pallas_src>

<mosaic_0001>
module attributes {stable_mosaic.version = 11 : i64} {
  func.func @_cbow_kernel(%arg0: i32, %arg1: memref<128xi32, #tpu.memory_space<smem>>, %arg2: memref<128x128xf32, #tpu.memory_space<vmem>>, %arg3: memref<128x128xbf16, #tpu.memory_space<vmem>>, %arg4: memref<1x128xf32, #tpu.memory_space<vmem>>, %arg5: memref<128x128xbf16, #tpu.memory_space<vmem>>, %arg6: memref<1x128xf32, #tpu.memory_space<vmem>>, %arg7: memref<128x128xbf16, #tpu.memory_space<vmem>>, %arg8: memref<1x128xf32, #tpu.memory_space<vmem>>, %arg9: memref<16x128xf32, #tpu.memory_space<vmem>>, %arg10: memref<16x128xf32, #tpu.memory_space<vmem>>) attributes {dimension_semantics = [#tpu.dimension_semantics<parallel>], iteration_bounds = array<i64: 1>, scalar_prefetch = 1 : i64, scratch_operands = 1 : i64, tpu.core_type = #tpu.core_type<tc>, window_params = [{pipeline_mode = #tpu.pipeline_mode<synchronous>, transform_indices = @transform_0, window_bounds = array<i64: 128, 128>}, {pipeline_mode = #tpu.pipeline_mode<synchronous>, transform_indices = @transform_1, window_bounds = array<i64: 128, 128>}, {pipeline_mode = #tpu.pipeline_mode<synchronous>, transform_indices = @transform_2, window_bounds = array<i64: 1, 128>}, {pipeline_mode = #tpu.pipeline_mode<synchronous>, transform_indices = @transform_3, window_bounds = array<i64: 128, 128>}, {pipeline_mode = #tpu.pipeline_mode<synchronous>, transform_indices = @transform_4, window_bounds = array<i64: 1, 128>}, {pipeline_mode = #tpu.pipeline_mode<synchronous>, transform_indices = @transform_5, window_bounds = array<i64: 128, 128>}, {pipeline_mode = #tpu.pipeline_mode<synchronous>, transform_indices = @transform_6, window_bounds = array<i64: 1, 128>}, {transform_indices = @transform_7, window_bounds = array<i64: 16, 128>}]} {
    %c16_i32 = arith.constant 16 : i32
    %0 = arith.muli %arg0, %c16_i32 : i32
    %c0_i32 = arith.constant 0 : i32
    %1 = arith.addi %0, %c0_i32 : i32
    %c0_i32_0 = arith.constant 0 : i32
    %2 = arith.addi %1, %c0_i32_0 : i32
    %c8_i32 = arith.constant 8 : i32
    %3 = arith.muli %2, %c8_i32 : i32
    %c0_i32_1 = arith.constant 0 : i32
    %4 = arith.addi %3, %c0_i32_1 : i32
    %5 = arith.index_cast %4 : i32 to index
    %6 = memref.load %arg1[%5] : memref<128xi32, #tpu.memory_space<smem>>
    %7 = arith.index_cast %6 : i32 to index
    %c0 = arith.constant 0 : index
    %8 = vector.load %arg2[%7, %c0] : memref<128x128xf32, #tpu.memory_space<vmem>>, vector<1x128xf32>
    %c8_i32_2 = arith.constant 8 : i32
    %9 = arith.muli %2, %c8_i32_2 : i32
    %c1_i32 = arith.constant 1 : i32
    %10 = arith.addi %9, %c1_i32 : i32
    %11 = arith.index_cast %10 : i32 to index
    %12 = memref.load %arg1[%11] : memref<128xi32, #tpu.memory_space<smem>>
    %13 = arith.index_cast %12 : i32 to index
    %c0_3 = arith.constant 0 : index
    %14 = vector.load %arg2[%13, %c0_3] : memref<128x128xf32, #tpu.memory_space<vmem>>, vector<1x128xf32>
    %c8_i32_4 = arith.constant 8 : i32
    %15 = arith.muli %2, %c8_i32_4 : i32
    %c2_i32 = arith.constant 2 : i32
    %16 = arith.addi %15, %c2_i32 : i32
    %17 = arith.index_cast %16 : i32 to index
    %18 = memref.load %arg1[%17] : memref<128xi32, #tpu.memory_space<smem>>
    %19 = arith.index_cast %18 : i32 to index
    %c0_5 = arith.constant 0 : index
    %20 = vector.load %arg2[%19, %c0_5] : memref<128x128xf32, #tpu.memory_space<vmem>>, vector<1x128xf32>
    %c8_i32_6 = arith.constant 8 : i32
    %21 = arith.muli %2, %c8_i32_6 : i32
    %c3_i32 = arith.constant 3 : i32
    %22 = arith.addi %21, %c3_i32 : i32
    %23 = arith.index_cast %22 : i32 to index
    %24 = memref.load %arg1[%23] : memref<128xi32, #tpu.memory_space<smem>>
    %25 = arith.index_cast %24 : i32 to index
    %c0_7 = arith.constant 0 : index
    %26 = vector.load %arg2[%25, %c0_7] : memref<128x128xf32, #tpu.memory_space<vmem>>, vector<1x128xf32>
    %c8_i32_8 = arith.constant 8 : i32
    %27 = arith.muli %2, %c8_i32_8 : i32
    %c4_i32 = arith.constant 4 : i32
    %28 = arith.addi %27, %c4_i32 : i32
    %29 = arith.index_cast %28 : i32 to index
    %30 = memref.load %arg1[%29] : memref<128xi32, #tpu.memory_space<smem>>
    %31 = arith.index_cast %30 : i32 to index
    %c0_9 = arith.constant 0 : index
    %32 = vector.load %arg2[%31, %c0_9] : memref<128x128xf32, #tpu.memory_space<vmem>>, vector<1x128xf32>
    %c8_i32_10 = arith.constant 8 : i32
    %33 = arith.muli %2, %c8_i32_10 : i32
    %c5_i32 = arith.constant 5 : i32
    %34 = arith.addi %33, %c5_i32 : i32
    %35 = arith.index_cast %34 : i32 to index
    %36 = memref.load %arg1[%35] : memref<128xi32, #tpu.memory_space<smem>>
    %37 = arith.index_cast %36 : i32 to index
    %c0_11 = arith.constant 0 : index
    %38 = vector.load %arg2[%37, %c0_11] : memref<128x128xf32, #tpu.memory_space<vmem>>, vector<1x128xf32>
    %c8_i32_12 = arith.constant 8 : i32
    %39 = arith.muli %2, %c8_i32_12 : i32
    %c6_i32 = arith.constant 6 : i32
    %40 = arith.addi %39, %c6_i32 : i32
    %41 = arith.index_cast %40 : i32 to index
    %42 = memref.load %arg1[%41] : memref<128xi32, #tpu.memory_space<smem>>
    %43 = arith.index_cast %42 : i32 to index
    %c0_13 = arith.constant 0 : index
    %44 = vector.load %arg2[%43, %c0_13] : memref<128x128xf32, #tpu.memory_space<vmem>>, vector<1x128xf32>
    %c8_i32_14 = arith.constant 8 : i32
    %45 = arith.muli %2, %c8_i32_14 : i32
    %c7_i32 = arith.constant 7 : i32
    %46 = arith.addi %45, %c7_i32 : i32
    %47 = arith.index_cast %46 : i32 to index
    %48 = memref.load %arg1[%47] : memref<128xi32, #tpu.memory_space<smem>>
    %49 = arith.index_cast %48 : i32 to index
    %c0_15 = arith.constant 0 : index
    %50 = vector.load %arg2[%49, %c0_15] : memref<128x128xf32, #tpu.memory_space<vmem>>, vector<1x128xf32>
    %51 = arith.addf %8, %14 : vector<1x128xf32>
    %52 = arith.addf %20, %26 : vector<1x128xf32>
    %53 = arith.addf %32, %38 : vector<1x128xf32>
    %54 = arith.addf %44, %50 : vector<1x128xf32>
    %55 = arith.addf %51, %52 : vector<1x128xf32>
    %56 = arith.addf %53, %54 : vector<1x128xf32>
    %57 = arith.addf %55, %56 : vector<1x128xf32>
    %c0_i32_16 = arith.constant 0 : i32
    %58 = arith.addi %0, %c0_i32_16 : i32
    %c1_i32_17 = arith.constant 1 : i32
    %59 = arith.addi %58, %c1_i32_17 : i32
    %c8_i32_18 = arith.constant 8 : i32
    %60 = arith.muli %59, %c8_i32_18 : i32
    %c0_i32_19 = arith.constant 0 : i32
    %61 = arith.addi %60, %c0_i32_19 : i32
    %62 = arith.index_cast %61 : i32 to index
    %63 = memref.load %arg1[%62] : memref<128xi32, #tpu.memory_space<smem>>
    %64 = arith.index_cast %63 : i32 to index
    %c0_20 = arith.constant 0 : index
    %65 = vector.load %arg2[%64, %c0_20] : memref<128x128xf32, #tpu.memory_space<vmem>>, vector<1x128xf32>
    %c8_i32_21 = arith.constant 8 : i32
    %66 = arith.muli %59, %c8_i32_21 : i32
    %c1_i32_22 = arith.constant 1 : i32
    %67 = arith.addi %66, %c1_i32_22 : i32
    %68 = arith.index_cast %67 : i32 to index
    %69 = memref.load %arg1[%68] : memref<128xi32, #tpu.memory_space<smem>>
    %70 = arith.index_cast %69 : i32 to index
    %c0_23 = arith.constant 0 : index
    %71 = vector.load %arg2[%70, %c0_23] : memref<128x128xf32, #tpu.memory_space<vmem>>, vector<1x128xf32>
    %c8_i32_24 = arith.constant 8 : i32
    %72 = arith.muli %59, %c8_i32_24 : i32
    %c2_i32_25 = arith.constant 2 : i32
    %73 = arith.addi %72, %c2_i32_25 : i32
    %74 = arith.index_cast %73 : i32 to index
    %75 = memref.load %arg1[%74] : memref<128xi32, #tpu.memory_space<smem>>
    %76 = arith.index_cast %75 : i32 to index
    %c0_26 = arith.constant 0 : index
    %77 = vector.load %arg2[%76, %c0_26] : memref<128x128xf32, #tpu.memory_space<vmem>>, vector<1x128xf32>
    %c8_i32_27 = arith.constant 8 : i32
    %78 = arith.muli %59, %c8_i32_27 : i32
    %c3_i32_28 = arith.constant 3 : i32
    %79 = arith.addi %78, %c3_i32_28 : i32
    %80 = arith.index_cast %79 : i32 to index
    %81 = memref.load %arg1[%80] : memref<128xi32, #tpu.memory_space<smem>>
    %82 = arith.index_cast %81 : i32 to index
    %c0_29 = arith.constant 0 : index
    %83 = vector.load %arg2[%82, %c0_29] : memref<128x128xf32, #tpu.memory_space<vmem>>, vector<1x128xf32>
    %c8_i32_30 = arith.constant 8 : i32
    %84 = arith.muli %59, %c8_i32_30 : i32
    %c4_i32_31 = arith.constant 4 : i32
    %85 = arith.addi %84, %c4_i32_31 : i32
    %86 = arith.index_cast %85 : i32 to index
    %87 = memref.load %arg1[%86] : memref<128xi32, #tpu.memory_space<smem>>
    %88 = arith.index_cast %87 : i32 to index
    %c0_32 = arith.constant 0 : index
    %89 = vector.load %arg2[%88, %c0_32] : memref<128x128xf32, #tpu.memory_space<vmem>>, vector<1x128xf32>
    %c8_i32_33 = arith.constant 8 : i32
    %90 = arith.muli %59, %c8_i32_33 : i32
    %c5_i32_34 = arith.constant 5 : i32
    %91 = arith.addi %90, %c5_i32_34 : i32
    %92 = arith.index_cast %91 : i32 to index
    %93 = memref.load %arg1[%92] : memref<128xi32, #tpu.memory_space<smem>>
    %94 = arith.index_cast %93 : i32 to index
    %c0_35 = arith.constant 0 : index
    %95 = vector.load %arg2[%94, %c0_35] : memref<128x128xf32, #tpu.memory_space<vmem>>, vector<1x128xf32>
    %c8_i32_36 = arith.constant 8 : i32
    %96 = arith.muli %59, %c8_i32_36 : i32
    %c6_i32_37 = arith.constant 6 : i32
    %97 = arith.addi %96, %c6_i32_37 : i32
    %98 = arith.index_cast %97 : i32 to index
    %99 = memref.load %arg1[%98] : memref<128xi32, #tpu.memory_space<smem>>
    %100 = arith.index_cast %99 : i32 to index
    %c0_38 = arith.constant 0 : index
    %101 = vector.load %arg2[%100, %c0_38] : memref<128x128xf32, #tpu.memory_space<vmem>>, vector<1x128xf32>
    %c8_i32_39 = arith.constant 8 : i32
    %102 = arith.muli %59, %c8_i32_39 : i32
    %c7_i32_40 = arith.constant 7 : i32
    %103 = arith.addi %102, %c7_i32_40 : i32
    %104 = arith.index_cast %103 : i32 to index
    %105 = memref.load %arg1[%104] : memref<128xi32, #tpu.memory_space<smem>>
    %106 = arith.index_cast %105 : i32 to index
    %c0_41 = arith.constant 0 : index
    %107 = vector.load %arg2[%106, %c0_41] : memref<128x128xf32, #tpu.memory_space<vmem>>, vector<1x128xf32>
    %108 = arith.addf %65, %71 : vector<1x128xf32>
    %109 = arith.addf %77, %83 : vector<1x128xf32>
    %110 = arith.addf %89, %95 : vector<1x128xf32>
    %111 = arith.addf %101, %107 : vector<1x128xf32>
    %112 = arith.addf %108, %109 : vector<1x128xf32>
    %113 = arith.addf %110, %111 : vector<1x128xf32>
    %114 = arith.addf %112, %113 : vector<1x128xf32>
    %c0_i32_42 = arith.constant 0 : i32
    %115 = arith.addi %0, %c0_i32_42 : i32
    %c2_i32_43 = arith.constant 2 : i32
    %116 = arith.addi %115, %c2_i32_43 : i32
    %c8_i32_44 = arith.constant 8 : i32
    %117 = arith.muli %116, %c8_i32_44 : i32
    %c0_i32_45 = arith.constant 0 : i32
    %118 = arith.addi %117, %c0_i32_45 : i32
    %119 = arith.index_cast %118 : i32 to index
    %120 = memref.load %arg1[%119] : memref<128xi32, #tpu.memory_space<smem>>
    %121 = arith.index_cast %120 : i32 to index
    %c0_46 = arith.constant 0 : index
    %122 = vector.load %arg2[%121, %c0_46] : memref<128x128xf32, #tpu.memory_space<vmem>>, vector<1x128xf32>
    %c8_i32_47 = arith.constant 8 : i32
    %123 = arith.muli %116, %c8_i32_47 : i32
    %c1_i32_48 = arith.constant 1 : i32
    %124 = arith.addi %123, %c1_i32_48 : i32
    %125 = arith.index_cast %124 : i32 to index
    %126 = memref.load %arg1[%125] : memref<128xi32, #tpu.memory_space<smem>>
    %127 = arith.index_cast %126 : i32 to index
    %c0_49 = arith.constant 0 : index
    %128 = vector.load %arg2[%127, %c0_49] : memref<128x128xf32, #tpu.memory_space<vmem>>, vector<1x128xf32>
    %c8_i32_50 = arith.constant 8 : i32
    %129 = arith.muli %116, %c8_i32_50 : i32
    %c2_i32_51 = arith.constant 2 : i32
    %130 = arith.addi %129, %c2_i32_51 : i32
    %131 = arith.index_cast %130 : i32 to index
    %132 = memref.load %arg1[%131] : memref<128xi32, #tpu.memory_space<smem>>
    %133 = arith.index_cast %132 : i32 to index
    %c0_52 = arith.constant 0 : index
    %134 = vector.load %arg2[%133, %c0_52] : memref<128x128xf32, #tpu.memory_space<vmem>>, vector<1x128xf32>
    %c8_i32_53 = arith.constant 8 : i32
    %135 = arith.muli %116, %c8_i32_53 : i32
    %c3_i32_54 = arith.constant 3 : i32
    %136 = arith.addi %135, %c3_i32_54 : i32
    %137 = arith.index_cast %136 : i32 to index
    %138 = memref.load %arg1[%137] : memref<128xi32, #tpu.memory_space<smem>>
    %139 = arith.index_cast %138 : i32 to index
    %c0_55 = arith.constant 0 : index
    %140 = vector.load %arg2[%139, %c0_55] : memref<128x128xf32, #tpu.memory_space<vmem>>, vector<1x128xf32>
    %c8_i32_56 = arith.constant 8 : i32
    %141 = arith.muli %116, %c8_i32_56 : i32
    %c4_i32_57 = arith.constant 4 : i32
    %142 = arith.addi %141, %c4_i32_57 : i32
    %143 = arith.index_cast %142 : i32 to index
    %144 = memref.load %arg1[%143] : memref<128xi32, #tpu.memory_space<smem>>
    %145 = arith.index_cast %144 : i32 to index
    %c0_58 = arith.constant 0 : index
    %146 = vector.load %arg2[%145, %c0_58] : memref<128x128xf32, #tpu.memory_space<vmem>>, vector<1x128xf32>
    %c8_i32_59 = arith.constant 8 : i32
    %147 = arith.muli %116, %c8_i32_59 : i32
    %c5_i32_60 = arith.constant 5 : i32
    %148 = arith.addi %147, %c5_i32_60 : i32
    %149 = arith.index_cast %148 : i32 to index
    %150 = memref.load %arg1[%149] : memref<128xi32, #tpu.memory_space<smem>>
    %151 = arith.index_cast %150 : i32 to index
    %c0_61 = arith.constant 0 : index
    %152 = vector.load %arg2[%151, %c0_61] : memref<128x128xf32, #tpu.memory_space<vmem>>, vector<1x128xf32>
    %c8_i32_62 = arith.constant 8 : i32
    %153 = arith.muli %116, %c8_i32_62 : i32
    %c6_i32_63 = arith.constant 6 : i32
    %154 = arith.addi %153, %c6_i32_63 : i32
    %155 = arith.index_cast %154 : i32 to index
    %156 = memref.load %arg1[%155] : memref<128xi32, #tpu.memory_space<smem>>
    %157 = arith.index_cast %156 : i32 to index
    %c0_64 = arith.constant 0 : index
    %158 = vector.load %arg2[%157, %c0_64] : memref<128x128xf32, #tpu.memory_space<vmem>>, vector<1x128xf32>
    %c8_i32_65 = arith.constant 8 : i32
    %159 = arith.muli %116, %c8_i32_65 : i32
    %c7_i32_66 = arith.constant 7 : i32
    %160 = arith.addi %159, %c7_i32_66 : i32
    %161 = arith.index_cast %160 : i32 to index
    %162 = memref.load %arg1[%161] : memref<128xi32, #tpu.memory_space<smem>>
    %163 = arith.index_cast %162 : i32 to index
    %c0_67 = arith.constant 0 : index
    %164 = vector.load %arg2[%163, %c0_67] : memref<128x128xf32, #tpu.memory_space<vmem>>, vector<1x128xf32>
    %165 = arith.addf %122, %128 : vector<1x128xf32>
    %166 = arith.addf %134, %140 : vector<1x128xf32>
    %167 = arith.addf %146, %152 : vector<1x128xf32>
    %168 = arith.addf %158, %164 : vector<1x128xf32>
    %169 = arith.addf %165, %166 : vector<1x128xf32>
    %170 = arith.addf %167, %168 : vector<1x128xf32>
    %171 = arith.addf %169, %170 : vector<1x128xf32>
    %c0_i32_68 = arith.constant 0 : i32
    %172 = arith.addi %0, %c0_i32_68 : i32
    %c3_i32_69 = arith.constant 3 : i32
    %173 = arith.addi %172, %c3_i32_69 : i32
    %c8_i32_70 = arith.constant 8 : i32
    %174 = arith.muli %173, %c8_i32_70 : i32
    %c0_i32_71 = arith.constant 0 : i32
    %175 = arith.addi %174, %c0_i32_71 : i32
    %176 = arith.index_cast %175 : i32 to index
    %177 = memref.load %arg1[%176] : memref<128xi32, #tpu.memory_space<smem>>
    %178 = arith.index_cast %177 : i32 to index
    %c0_72 = arith.constant 0 : index
    %179 = vector.load %arg2[%178, %c0_72] : memref<128x128xf32, #tpu.memory_space<vmem>>, vector<1x128xf32>
    %c8_i32_73 = arith.constant 8 : i32
    %180 = arith.muli %173, %c8_i32_73 : i32
    %c1_i32_74 = arith.constant 1 : i32
    %181 = arith.addi %180, %c1_i32_74 : i32
    %182 = arith.index_cast %181 : i32 to index
    %183 = memref.load %arg1[%182] : memref<128xi32, #tpu.memory_space<smem>>
    %184 = arith.index_cast %183 : i32 to index
    %c0_75 = arith.constant 0 : index
    %185 = vector.load %arg2[%184, %c0_75] : memref<128x128xf32, #tpu.memory_space<vmem>>, vector<1x128xf32>
    %c8_i32_76 = arith.constant 8 : i32
    %186 = arith.muli %173, %c8_i32_76 : i32
    %c2_i32_77 = arith.constant 2 : i32
    %187 = arith.addi %186, %c2_i32_77 : i32
    %188 = arith.index_cast %187 : i32 to index
    %189 = memref.load %arg1[%188] : memref<128xi32, #tpu.memory_space<smem>>
    %190 = arith.index_cast %189 : i32 to index
    %c0_78 = arith.constant 0 : index
    %191 = vector.load %arg2[%190, %c0_78] : memref<128x128xf32, #tpu.memory_space<vmem>>, vector<1x128xf32>
    %c8_i32_79 = arith.constant 8 : i32
    %192 = arith.muli %173, %c8_i32_79 : i32
    %c3_i32_80 = arith.constant 3 : i32
    %193 = arith.addi %192, %c3_i32_80 : i32
    %194 = arith.index_cast %193 : i32 to index
    %195 = memref.load %arg1[%194] : memref<128xi32, #tpu.memory_space<smem>>
    %196 = arith.index_cast %195 : i32 to index
    %c0_81 = arith.constant 0 : index
    %197 = vector.load %arg2[%196, %c0_81] : memref<128x128xf32, #tpu.memory_space<vmem>>, vector<1x128xf32>
    %c8_i32_82 = arith.constant 8 : i32
    %198 = arith.muli %173, %c8_i32_82 : i32
    %c4_i32_83 = arith.constant 4 : i32
    %199 = arith.addi %198, %c4_i32_83 : i32
    %200 = arith.index_cast %199 : i32 to index
    %201 = memref.load %arg1[%200] : memref<128xi32, #tpu.memory_space<smem>>
    %202 = arith.index_cast %201 : i32 to index
    %c0_84 = arith.constant 0 : index
    %203 = vector.load %arg2[%202, %c0_84] : memref<128x128xf32, #tpu.memory_space<vmem>>, vector<1x128xf32>
    %c8_i32_85 = arith.constant 8 : i32
    %204 = arith.muli %173, %c8_i32_85 : i32
    %c5_i32_86 = arith.constant 5 : i32
    %205 = arith.addi %204, %c5_i32_86 : i32
    %206 = arith.index_cast %205 : i32 to index
    %207 = memref.load %arg1[%206] : memref<128xi32, #tpu.memory_space<smem>>
    %208 = arith.index_cast %207 : i32 to index
    %c0_87 = arith.constant 0 : index
    %209 = vector.load %arg2[%208, %c0_87] : memref<128x128xf32, #tpu.memory_space<vmem>>, vector<1x128xf32>
    %c8_i32_88 = arith.constant 8 : i32
    %210 = arith.muli %173, %c8_i32_88 : i32
    %c6_i32_89 = arith.constant 6 : i32
    %211 = arith.addi %210, %c6_i32_89 : i32
    %212 = arith.index_cast %211 : i32 to index
    %213 = memref.load %arg1[%212] : memref<128xi32, #tpu.memory_space<smem>>
    %214 = arith.index_cast %213 : i32 to index
    %c0_90 = arith.constant 0 : index
    %215 = vector.load %arg2[%214, %c0_90] : memref<128x128xf32, #tpu.memory_space<vmem>>, vector<1x128xf32>
    %c8_i32_91 = arith.constant 8 : i32
    %216 = arith.muli %173, %c8_i32_91 : i32
    %c7_i32_92 = arith.constant 7 : i32
    %217 = arith.addi %216, %c7_i32_92 : i32
    %218 = arith.index_cast %217 : i32 to index
    %219 = memref.load %arg1[%218] : memref<128xi32, #tpu.memory_space<smem>>
    %220 = arith.index_cast %219 : i32 to index
    %c0_93 = arith.constant 0 : index
    %221 = vector.load %arg2[%220, %c0_93] : memref<128x128xf32, #tpu.memory_space<vmem>>, vector<1x128xf32>
    %222 = arith.addf %179, %185 : vector<1x128xf32>
    %223 = arith.addf %191, %197 : vector<1x128xf32>
    %224 = arith.addf %203, %209 : vector<1x128xf32>
    %225 = arith.addf %215, %221 : vector<1x128xf32>
    %226 = arith.addf %222, %223 : vector<1x128xf32>
    %227 = arith.addf %224, %225 : vector<1x128xf32>
    %228 = arith.addf %226, %227 : vector<1x128xf32>
    %c0_i32_94 = arith.constant 0 : i32
    %229 = arith.addi %0, %c0_i32_94 : i32
    %c4_i32_95 = arith.constant 4 : i32
    %230 = arith.addi %229, %c4_i32_95 : i32
    %c8_i32_96 = arith.constant 8 : i32
    %231 = arith.muli %230, %c8_i32_96 : i32
    %c0_i32_97 = arith.constant 0 : i32
    %232 = arith.addi %231, %c0_i32_97 : i32
    %233 = arith.index_cast %232 : i32 to index
    %234 = memref.load %arg1[%233] : memref<128xi32, #tpu.memory_space<smem>>
    %235 = arith.index_cast %234 : i32 to index
    %c0_98 = arith.constant 0 : index
    %236 = vector.load %arg2[%235, %c0_98] : memref<128x128xf32, #tpu.memory_space<vmem>>, vector<1x128xf32>
    %c8_i32_99 = arith.constant 8 : i32
    %237 = arith.muli %230, %c8_i32_99 : i32
    %c1_i32_100 = arith.constant 1 : i32
    %238 = arith.addi %237, %c1_i32_100 : i32
    %239 = arith.index_cast %238 : i32 to index
    %240 = memref.load %arg1[%239] : memref<128xi32, #tpu.memory_space<smem>>
    %241 = arith.index_cast %240 : i32 to index
    %c0_101 = arith.constant 0 : index
    %242 = vector.load %arg2[%241, %c0_101] : memref<128x128xf32, #tpu.memory_space<vmem>>, vector<1x128xf32>
    %c8_i32_102 = arith.constant 8 : i32
    %243 = arith.muli %230, %c8_i32_102 : i32
    %c2_i32_103 = arith.constant 2 : i32
    %244 = arith.addi %243, %c2_i32_103 : i32
    %245 = arith.index_cast %244 : i32 to index
    %246 = memref.load %arg1[%245] : memref<128xi32, #tpu.memory_space<smem>>
    %247 = arith.index_cast %246 : i32 to index
    %c0_104 = arith.constant 0 : index
    %248 = vector.load %arg2[%247, %c0_104] : memref<128x128xf32, #tpu.memory_space<vmem>>, vector<1x128xf32>
    %c8_i32_105 = arith.constant 8 : i32
    %249 = arith.muli %230, %c8_i32_105 : i32
    %c3_i32_106 = arith.constant 3 : i32
    %250 = arith.addi %249, %c3_i32_106 : i32
    %251 = arith.index_cast %250 : i32 to index
    %252 = memref.load %arg1[%251] : memref<128xi32, #tpu.memory_space<smem>>
    %253 = arith.index_cast %252 : i32 to index
    %c0_107 = arith.constant 0 : index
    %254 = vector.load %arg2[%253, %c0_107] : memref<128x128xf32, #tpu.memory_space<vmem>>, vector<1x128xf32>
    %c8_i32_108 = arith.constant 8 : i32
    %255 = arith.muli %230, %c8_i32_108 : i32
    %c4_i32_109 = arith.constant 4 : i32
    %256 = arith.addi %255, %c4_i32_109 : i32
    %257 = arith.index_cast %256 : i32 to index
    %258 = memref.load %arg1[%257] : memref<128xi32, #tpu.memory_space<smem>>
    %259 = arith.index_cast %258 : i32 to index
    %c0_110 = arith.constant 0 : index
    %260 = vector.load %arg2[%259, %c0_110] : memref<128x128xf32, #tpu.memory_space<vmem>>, vector<1x128xf32>
    %c8_i32_111 = arith.constant 8 : i32
    %261 = arith.muli %230, %c8_i32_111 : i32
    %c5_i32_112 = arith.constant 5 : i32
    %262 = arith.addi %261, %c5_i32_112 : i32
    %263 = arith.index_cast %262 : i32 to index
    %264 = memref.load %arg1[%263] : memref<128xi32, #tpu.memory_space<smem>>
    %265 = arith.index_cast %264 : i32 to index
    %c0_113 = arith.constant 0 : index
    %266 = vector.load %arg2[%265, %c0_113] : memref<128x128xf32, #tpu.memory_space<vmem>>, vector<1x128xf32>
    %c8_i32_114 = arith.constant 8 : i32
    %267 = arith.muli %230, %c8_i32_114 : i32
    %c6_i32_115 = arith.constant 6 : i32
    %268 = arith.addi %267, %c6_i32_115 : i32
    %269 = arith.index_cast %268 : i32 to index
    %270 = memref.load %arg1[%269] : memref<128xi32, #tpu.memory_space<smem>>
    %271 = arith.index_cast %270 : i32 to index
    %c0_116 = arith.constant 0 : index
    %272 = vector.load %arg2[%271, %c0_116] : memref<128x128xf32, #tpu.memory_space<vmem>>, vector<1x128xf32>
    %c8_i32_117 = arith.constant 8 : i32
    %273 = arith.muli %230, %c8_i32_117 : i32
    %c7_i32_118 = arith.constant 7 : i32
    %274 = arith.addi %273, %c7_i32_118 : i32
    %275 = arith.index_cast %274 : i32 to index
    %276 = memref.load %arg1[%275] : memref<128xi32, #tpu.memory_space<smem>>
    %277 = arith.index_cast %276 : i32 to index
    %c0_119 = arith.constant 0 : index
    %278 = vector.load %arg2[%277, %c0_119] : memref<128x128xf32, #tpu.memory_space<vmem>>, vector<1x128xf32>
    %279 = arith.addf %236, %242 : vector<1x128xf32>
    %280 = arith.addf %248, %254 : vector<1x128xf32>
    %281 = arith.addf %260, %266 : vector<1x128xf32>
    %282 = arith.addf %272, %278 : vector<1x128xf32>
    %283 = arith.addf %279, %280 : vector<1x128xf32>
    %284 = arith.addf %281, %282 : vector<1x128xf32>
    %285 = arith.addf %283, %284 : vector<1x128xf32>
    %c0_i32_120 = arith.constant 0 : i32
    %286 = arith.addi %0, %c0_i32_120 : i32
    %c5_i32_121 = arith.constant 5 : i32
    %287 = arith.addi %286, %c5_i32_121 : i32
    %c8_i32_122 = arith.constant 8 : i32
    %288 = arith.muli %287, %c8_i32_122 : i32
    %c0_i32_123 = arith.constant 0 : i32
    %289 = arith.addi %288, %c0_i32_123 : i32
    %290 = arith.index_cast %289 : i32 to index
    %291 = memref.load %arg1[%290] : memref<128xi32, #tpu.memory_space<smem>>
    %292 = arith.index_cast %291 : i32 to index
    %c0_124 = arith.constant 0 : index
    %293 = vector.load %arg2[%292, %c0_124] : memref<128x128xf32, #tpu.memory_space<vmem>>, vector<1x128xf32>
    %c8_i32_125 = arith.constant 8 : i32
    %294 = arith.muli %287, %c8_i32_125 : i32
    %c1_i32_126 = arith.constant 1 : i32
    %295 = arith.addi %294, %c1_i32_126 : i32
    %296 = arith.index_cast %295 : i32 to index
    %297 = memref.load %arg1[%296] : memref<128xi32, #tpu.memory_space<smem>>
    %298 = arith.index_cast %297 : i32 to index
    %c0_127 = arith.constant 0 : index
    %299 = vector.load %arg2[%298, %c0_127] : memref<128x128xf32, #tpu.memory_space<vmem>>, vector<1x128xf32>
    %c8_i32_128 = arith.constant 8 : i32
    %300 = arith.muli %287, %c8_i32_128 : i32
    %c2_i32_129 = arith.constant 2 : i32
    %301 = arith.addi %300, %c2_i32_129 : i32
    %302 = arith.index_cast %301 : i32 to index
    %303 = memref.load %arg1[%302] : memref<128xi32, #tpu.memory_space<smem>>
    %304 = arith.index_cast %303 : i32 to index
    %c0_130 = arith.constant 0 : index
    %305 = vector.load %arg2[%304, %c0_130] : memref<128x128xf32, #tpu.memory_space<vmem>>, vector<1x128xf32>
    %c8_i32_131 = arith.constant 8 : i32
    %306 = arith.muli %287, %c8_i32_131 : i32
    %c3_i32_132 = arith.constant 3 : i32
    %307 = arith.addi %306, %c3_i32_132 : i32
    %308 = arith.index_cast %307 : i32 to index
    %309 = memref.load %arg1[%308] : memref<128xi32, #tpu.memory_space<smem>>
    %310 = arith.index_cast %309 : i32 to index
    %c0_133 = arith.constant 0 : index
    %311 = vector.load %arg2[%310, %c0_133] : memref<128x128xf32, #tpu.memory_space<vmem>>, vector<1x128xf32>
    %c8_i32_134 = arith.constant 8 : i32
    %312 = arith.muli %287, %c8_i32_134 : i32
    %c4_i32_135 = arith.constant 4 : i32
    %313 = arith.addi %312, %c4_i32_135 : i32
    %314 = arith.index_cast %313 : i32 to index
    %315 = memref.load %arg1[%314] : memref<128xi32, #tpu.memory_space<smem>>
    %316 = arith.index_cast %315 : i32 to index
    %c0_136 = arith.constant 0 : index
    %317 = vector.load %arg2[%316, %c0_136] : memref<128x128xf32, #tpu.memory_space<vmem>>, vector<1x128xf32>
    %c8_i32_137 = arith.constant 8 : i32
    %318 = arith.muli %287, %c8_i32_137 : i32
    %c5_i32_138 = arith.constant 5 : i32
    %319 = arith.addi %318, %c5_i32_138 : i32
    %320 = arith.index_cast %319 : i32 to index
    %321 = memref.load %arg1[%320] : memref<128xi32, #tpu.memory_space<smem>>
    %322 = arith.index_cast %321 : i32 to index
    %c0_139 = arith.constant 0 : index
    %323 = vector.load %arg2[%322, %c0_139] : memref<128x128xf32, #tpu.memory_space<vmem>>, vector<1x128xf32>
    %c8_i32_140 = arith.constant 8 : i32
    %324 = arith.muli %287, %c8_i32_140 : i32
    %c6_i32_141 = arith.constant 6 : i32
    %325 = arith.addi %324, %c6_i32_141 : i32
    %326 = arith.index_cast %325 : i32 to index
    %327 = memref.load %arg1[%326] : memref<128xi32, #tpu.memory_space<smem>>
    %328 = arith.index_cast %327 : i32 to index
    %c0_142 = arith.constant 0 : index
    %329 = vector.load %arg2[%328, %c0_142] : memref<128x128xf32, #tpu.memory_space<vmem>>, vector<1x128xf32>
    %c8_i32_143 = arith.constant 8 : i32
    %330 = arith.muli %287, %c8_i32_143 : i32
    %c7_i32_144 = arith.constant 7 : i32
    %331 = arith.addi %330, %c7_i32_144 : i32
    %332 = arith.index_cast %331 : i32 to index
    %333 = memref.load %arg1[%332] : memref<128xi32, #tpu.memory_space<smem>>
    %334 = arith.index_cast %333 : i32 to index
    %c0_145 = arith.constant 0 : index
    %335 = vector.load %arg2[%334, %c0_145] : memref<128x128xf32, #tpu.memory_space<vmem>>, vector<1x128xf32>
    %336 = arith.addf %293, %299 : vector<1x128xf32>
    %337 = arith.addf %305, %311 : vector<1x128xf32>
    %338 = arith.addf %317, %323 : vector<1x128xf32>
    %339 = arith.addf %329, %335 : vector<1x128xf32>
    %340 = arith.addf %336, %337 : vector<1x128xf32>
    %341 = arith.addf %338, %339 : vector<1x128xf32>
    %342 = arith.addf %340, %341 : vector<1x128xf32>
    %c0_i32_146 = arith.constant 0 : i32
    %343 = arith.addi %0, %c0_i32_146 : i32
    %c6_i32_147 = arith.constant 6 : i32
    %344 = arith.addi %343, %c6_i32_147 : i32
    %c8_i32_148 = arith.constant 8 : i32
    %345 = arith.muli %344, %c8_i32_148 : i32
    %c0_i32_149 = arith.constant 0 : i32
    %346 = arith.addi %345, %c0_i32_149 : i32
    %347 = arith.index_cast %346 : i32 to index
    %348 = memref.load %arg1[%347] : memref<128xi32, #tpu.memory_space<smem>>
    %349 = arith.index_cast %348 : i32 to index
    %c0_150 = arith.constant 0 : index
    %350 = vector.load %arg2[%349, %c0_150] : memref<128x128xf32, #tpu.memory_space<vmem>>, vector<1x128xf32>
    %c8_i32_151 = arith.constant 8 : i32
    %351 = arith.muli %344, %c8_i32_151 : i32
    %c1_i32_152 = arith.constant 1 : i32
    %352 = arith.addi %351, %c1_i32_152 : i32
    %353 = arith.index_cast %352 : i32 to index
    %354 = memref.load %arg1[%353] : memref<128xi32, #tpu.memory_space<smem>>
    %355 = arith.index_cast %354 : i32 to index
    %c0_153 = arith.constant 0 : index
    %356 = vector.load %arg2[%355, %c0_153] : memref<128x128xf32, #tpu.memory_space<vmem>>, vector<1x128xf32>
    %c8_i32_154 = arith.constant 8 : i32
    %357 = arith.muli %344, %c8_i32_154 : i32
    %c2_i32_155 = arith.constant 2 : i32
    %358 = arith.addi %357, %c2_i32_155 : i32
    %359 = arith.index_cast %358 : i32 to index
    %360 = memref.load %arg1[%359] : memref<128xi32, #tpu.memory_space<smem>>
    %361 = arith.index_cast %360 : i32 to index
    %c0_156 = arith.constant 0 : index
    %362 = vector.load %arg2[%361, %c0_156] : memref<128x128xf32, #tpu.memory_space<vmem>>, vector<1x128xf32>
    %c8_i32_157 = arith.constant 8 : i32
    %363 = arith.muli %344, %c8_i32_157 : i32
    %c3_i32_158 = arith.constant 3 : i32
    %364 = arith.addi %363, %c3_i32_158 : i32
    %365 = arith.index_cast %364 : i32 to index
    %366 = memref.load %arg1[%365] : memref<128xi32, #tpu.memory_space<smem>>
    %367 = arith.index_cast %366 : i32 to index
    %c0_159 = arith.constant 0 : index
    %368 = vector.load %arg2[%367, %c0_159] : memref<128x128xf32, #tpu.memory_space<vmem>>, vector<1x128xf32>
    %c8_i32_160 = arith.constant 8 : i32
    %369 = arith.muli %344, %c8_i32_160 : i32
    %c4_i32_161 = arith.constant 4 : i32
    %370 = arith.addi %369, %c4_i32_161 : i32
    %371 = arith.index_cast %370 : i32 to index
    %372 = memref.load %arg1[%371] : memref<128xi32, #tpu.memory_space<smem>>
    %373 = arith.index_cast %372 : i32 to index
    %c0_162 = arith.constant 0 : index
    %374 = vector.load %arg2[%373, %c0_162] : memref<128x128xf32, #tpu.memory_space<vmem>>, vector<1x128xf32>
    %c8_i32_163 = arith.constant 8 : i32
    %375 = arith.muli %344, %c8_i32_163 : i32
    %c5_i32_164 = arith.constant 5 : i32
    %376 = arith.addi %375, %c5_i32_164 : i32
    %377 = arith.index_cast %376 : i32 to index
    %378 = memref.load %arg1[%377] : memref<128xi32, #tpu.memory_space<smem>>
    %379 = arith.index_cast %378 : i32 to index
    %c0_165 = arith.constant 0 : index
    %380 = vector.load %arg2[%379, %c0_165] : memref<128x128xf32, #tpu.memory_space<vmem>>, vector<1x128xf32>
    %c8_i32_166 = arith.constant 8 : i32
    %381 = arith.muli %344, %c8_i32_166 : i32
    %c6_i32_167 = arith.constant 6 : i32
    %382 = arith.addi %381, %c6_i32_167 : i32
    %383 = arith.index_cast %382 : i32 to index
    %384 = memref.load %arg1[%383] : memref<128xi32, #tpu.memory_space<smem>>
    %385 = arith.index_cast %384 : i32 to index
    %c0_168 = arith.constant 0 : index
    %386 = vector.load %arg2[%385, %c0_168] : memref<128x128xf32, #tpu.memory_space<vmem>>, vector<1x128xf32>
    %c8_i32_169 = arith.constant 8 : i32
    %387 = arith.muli %344, %c8_i32_169 : i32
    %c7_i32_170 = arith.constant 7 : i32
    %388 = arith.addi %387, %c7_i32_170 : i32
    %389 = arith.index_cast %388 : i32 to index
    %390 = memref.load %arg1[%389] : memref<128xi32, #tpu.memory_space<smem>>
    %391 = arith.index_cast %390 : i32 to index
    %c0_171 = arith.constant 0 : index
    %392 = vector.load %arg2[%391, %c0_171] : memref<128x128xf32, #tpu.memory_space<vmem>>, vector<1x128xf32>
    %393 = arith.addf %350, %356 : vector<1x128xf32>
    %394 = arith.addf %362, %368 : vector<1x128xf32>
    %395 = arith.addf %374, %380 : vector<1x128xf32>
    %396 = arith.addf %386, %392 : vector<1x128xf32>
    %397 = arith.addf %393, %394 : vector<1x128xf32>
    %398 = arith.addf %395, %396 : vector<1x128xf32>
    %399 = arith.addf %397, %398 : vector<1x128xf32>
    %c0_i32_172 = arith.constant 0 : i32
    %400 = arith.addi %0, %c0_i32_172 : i32
    %c7_i32_173 = arith.constant 7 : i32
    %401 = arith.addi %400, %c7_i32_173 : i32
    %c8_i32_174 = arith.constant 8 : i32
    %402 = arith.muli %401, %c8_i32_174 : i32
    %c0_i32_175 = arith.constant 0 : i32
    %403 = arith.addi %402, %c0_i32_175 : i32
    %404 = arith.index_cast %403 : i32 to index
    %405 = memref.load %arg1[%404] : memref<128xi32, #tpu.memory_space<smem>>
    %406 = arith.index_cast %405 : i32 to index
    %c0_176 = arith.constant 0 : index
    %407 = vector.load %arg2[%406, %c0_176] : memref<128x128xf32, #tpu.memory_space<vmem>>, vector<1x128xf32>
    %c8_i32_177 = arith.constant 8 : i32
    %408 = arith.muli %401, %c8_i32_177 : i32
    %c1_i32_178 = arith.constant 1 : i32
    %409 = arith.addi %408, %c1_i32_178 : i32
    %410 = arith.index_cast %409 : i32 to index
    %411 = memref.load %arg1[%410] : memref<128xi32, #tpu.memory_space<smem>>
    %412 = arith.index_cast %411 : i32 to index
    %c0_179 = arith.constant 0 : index
    %413 = vector.load %arg2[%412, %c0_179] : memref<128x128xf32, #tpu.memory_space<vmem>>, vector<1x128xf32>
    %c8_i32_180 = arith.constant 8 : i32
    %414 = arith.muli %401, %c8_i32_180 : i32
    %c2_i32_181 = arith.constant 2 : i32
    %415 = arith.addi %414, %c2_i32_181 : i32
    %416 = arith.index_cast %415 : i32 to index
    %417 = memref.load %arg1[%416] : memref<128xi32, #tpu.memory_space<smem>>
    %418 = arith.index_cast %417 : i32 to index
    %c0_182 = arith.constant 0 : index
    %419 = vector.load %arg2[%418, %c0_182] : memref<128x128xf32, #tpu.memory_space<vmem>>, vector<1x128xf32>
    %c8_i32_183 = arith.constant 8 : i32
    %420 = arith.muli %401, %c8_i32_183 : i32
    %c3_i32_184 = arith.constant 3 : i32
    %421 = arith.addi %420, %c3_i32_184 : i32
    %422 = arith.index_cast %421 : i32 to index
    %423 = memref.load %arg1[%422] : memref<128xi32, #tpu.memory_space<smem>>
    %424 = arith.index_cast %423 : i32 to index
    %c0_185 = arith.constant 0 : index
    %425 = vector.load %arg2[%424, %c0_185] : memref<128x128xf32, #tpu.memory_space<vmem>>, vector<1x128xf32>
    %c8_i32_186 = arith.constant 8 : i32
    %426 = arith.muli %401, %c8_i32_186 : i32
    %c4_i32_187 = arith.constant 4 : i32
    %427 = arith.addi %426, %c4_i32_187 : i32
    %428 = arith.index_cast %427 : i32 to index
    %429 = memref.load %arg1[%428] : memref<128xi32, #tpu.memory_space<smem>>
    %430 = arith.index_cast %429 : i32 to index
    %c0_188 = arith.constant 0 : index
    %431 = vector.load %arg2[%430, %c0_188] : memref<128x128xf32, #tpu.memory_space<vmem>>, vector<1x128xf32>
    %c8_i32_189 = arith.constant 8 : i32
    %432 = arith.muli %401, %c8_i32_189 : i32
    %c5_i32_190 = arith.constant 5 : i32
    %433 = arith.addi %432, %c5_i32_190 : i32
    %434 = arith.index_cast %433 : i32 to index
    %435 = memref.load %arg1[%434] : memref<128xi32, #tpu.memory_space<smem>>
    %436 = arith.index_cast %435 : i32 to index
    %c0_191 = arith.constant 0 : index
    %437 = vector.load %arg2[%436, %c0_191] : memref<128x128xf32, #tpu.memory_space<vmem>>, vector<1x128xf32>
    %c8_i32_192 = arith.constant 8 : i32
    %438 = arith.muli %401, %c8_i32_192 : i32
    %c6_i32_193 = arith.constant 6 : i32
    %439 = arith.addi %438, %c6_i32_193 : i32
    %440 = arith.index_cast %439 : i32 to index
    %441 = memref.load %arg1[%440] : memref<128xi32, #tpu.memory_space<smem>>
    %442 = arith.index_cast %441 : i32 to index
    %c0_194 = arith.constant 0 : index
    %443 = vector.load %arg2[%442, %c0_194] : memref<128x128xf32, #tpu.memory_space<vmem>>, vector<1x128xf32>
    %c8_i32_195 = arith.constant 8 : i32
    %444 = arith.muli %401, %c8_i32_195 : i32
    %c7_i32_196 = arith.constant 7 : i32
    %445 = arith.addi %444, %c7_i32_196 : i32
    %446 = arith.index_cast %445 : i32 to index
    %447 = memref.load %arg1[%446] : memref<128xi32, #tpu.memory_space<smem>>
    %448 = arith.index_cast %447 : i32 to index
    %c0_197 = arith.constant 0 : index
    %449 = vector.load %arg2[%448, %c0_197] : memref<128x128xf32, #tpu.memory_space<vmem>>, vector<1x128xf32>
    %450 = arith.addf %407, %413 : vector<1x128xf32>
    %451 = arith.addf %419, %425 : vector<1x128xf32>
    %452 = arith.addf %431, %437 : vector<1x128xf32>
    %453 = arith.addf %443, %449 : vector<1x128xf32>
    %454 = arith.addf %450, %451 : vector<1x128xf32>
    %455 = arith.addf %452, %453 : vector<1x128xf32>
    %456 = arith.addf %454, %455 : vector<1x128xf32>
    %457 = tpu.concatenate %57, %114, %171, %228, %285, %342, %399, %456 in 0 : vector<1x128xf32>, vector<1x128xf32>, vector<1x128xf32>, vector<1x128xf32>, vector<1x128xf32>, vector<1x128xf32>, vector<1x128xf32>, vector<1x128xf32> -> vector<8x128xf32>
    %c0_198 = arith.constant 0 : index
    %c0_199 = arith.constant 0 : index
    %458 = vector.load %arg10[%c0_198, %c0_199] : memref<16x128xf32, #tpu.memory_space<vmem>>, vector<8x128xf32>
    tpu.vector_store %arg10[%c0_198, %c0_199], %457 {strides = array<i32>} : memref<16x128xf32, #tpu.memory_space<vmem>>, vector<8x128xf32>,
    %c8_i32_200 = arith.constant 8 : i32
    %459 = arith.addi %0, %c8_i32_200 : i32
    %c0_i32_201 = arith.constant 0 : i32
    %460 = arith.addi %459, %c0_i32_201 : i32
    %c8_i32_202 = arith.constant 8 : i32
    %461 = arith.muli %460, %c8_i32_202 : i32
    %c0_i32_203 = arith.constant 0 : i32
    %462 = arith.addi %461, %c0_i32_203 : i32
    %463 = arith.index_cast %462 : i32 to index
    %464 = memref.load %arg1[%463] : memref<128xi32, #tpu.memory_space<smem>>
    %465 = arith.index_cast %464 : i32 to index
    %c0_204 = arith.constant 0 : index
    %466 = vector.load %arg2[%465, %c0_204] : memref<128x128xf32, #tpu.memory_space<vmem>>, vector<1x128xf32>
    %c8_i32_205 = arith.constant 8 : i32
    %467 = arith.muli %460, %c8_i32_205 : i32
    %c1_i32_206 = arith.constant 1 : i32
    %468 = arith.addi %467, %c1_i32_206 : i32
    %469 = arith.index_cast %468 : i32 to index
    %470 = memref.load %arg1[%469] : memref<128xi32, #tpu.memory_space<smem>>
    %471 = arith.index_cast %470 : i32 to index
    %c0_207 = arith.constant 0 : index
    %472 = vector.load %arg2[%471, %c0_207] : memref<128x128xf32, #tpu.memory_space<vmem>>, vector<1x128xf32>
    %c8_i32_208 = arith.constant 8 : i32
    %473 = arith.muli %460, %c8_i32_208 : i32
    %c2_i32_209 = arith.constant 2 : i32
    %474 = arith.addi %473, %c2_i32_209 : i32
    %475 = arith.index_cast %474 : i32 to index
    %476 = memref.load %arg1[%475] : memref<128xi32, #tpu.memory_space<smem>>
    %477 = arith.index_cast %476 : i32 to index
    %c0_210 = arith.constant 0 : index
    %478 = vector.load %arg2[%477, %c0_210] : memref<128x128xf32, #tpu.memory_space<vmem>>, vector<1x128xf32>
    %c8_i32_211 = arith.constant 8 : i32
    %479 = arith.muli %460, %c8_i32_211 : i32
    %c3_i32_212 = arith.constant 3 : i32
    %480 = arith.addi %479, %c3_i32_212 : i32
    %481 = arith.index_cast %480 : i32 to index
    %482 = memref.load %arg1[%481] : memref<128xi32, #tpu.memory_space<smem>>
    %483 = arith.index_cast %482 : i32 to index
    %c0_213 = arith.constant 0 : index
    %484 = vector.load %arg2[%483, %c0_213] : memref<128x128xf32, #tpu.memory_space<vmem>>, vector<1x128xf32>
    %c8_i32_214 = arith.constant 8 : i32
    %485 = arith.muli %460, %c8_i32_214 : i32
    %c4_i32_215 = arith.constant 4 : i32
    %486 = arith.addi %485, %c4_i32_215 : i32
    %487 = arith.index_cast %486 : i32 to index
    %488 = memref.load %arg1[%487] : memref<128xi32, #tpu.memory_space<smem>>
    %489 = arith.index_cast %488 : i32 to index
    %c0_216 = arith.constant 0 : index
    %490 = vector.load %arg2[%489, %c0_216] : memref<128x128xf32, #tpu.memory_space<vmem>>, vector<1x128xf32>
    %c8_i32_217 = arith.constant 8 : i32
    %491 = arith.muli %460, %c8_i32_217 : i32
    %c5_i32_218 = arith.constant 5 : i32
    %492 = arith.addi %491, %c5_i32_218 : i32
    %493 = arith.index_cast %492 : i32 to index
    %494 = memref.load %arg1[%493] : memref<128xi32, #tpu.memory_space<smem>>
    %495 = arith.index_cast %494 : i32 to index
    %c0_219 = arith.constant 0 : index
    %496 = vector.load %arg2[%495, %c0_219] : memref<128x128xf32, #tpu.memory_space<vmem>>, vector<1x128xf32>
    %c8_i32_220 = arith.constant 8 : i32
    %497 = arith.muli %460, %c8_i32_220 : i32
    %c6_i32_221 = arith.constant 6 : i32
    %498 = arith.addi %497, %c6_i32_221 : i32
    %499 = arith.index_cast %498 : i32 to index
    %500 = memref.load %arg1[%499] : memref<128xi32, #tpu.memory_space<smem>>
    %501 = arith.index_cast %500 : i32 to index
    %c0_222 = arith.constant 0 : index
    %502 = vector.load %arg2[%501, %c0_222] : memref<128x128xf32, #tpu.memory_space<vmem>>, vector<1x128xf32>
    %c8_i32_223 = arith.constant 8 : i32
    %503 = arith.muli %460, %c8_i32_223 : i32
    %c7_i32_224 = arith.constant 7 : i32
    %504 = arith.addi %503, %c7_i32_224 : i32
    %505 = arith.index_cast %504 : i32 to index
    %506 = memref.load %arg1[%505] : memref<128xi32, #tpu.memory_space<smem>>
    %507 = arith.index_cast %506 : i32 to index
    %c0_225 = arith.constant 0 : index
    %508 = vector.load %arg2[%507, %c0_225] : memref<128x128xf32, #tpu.memory_space<vmem>>, vector<1x128xf32>
    %509 = arith.addf %466, %472 : vector<1x128xf32>
    %510 = arith.addf %478, %484 : vector<1x128xf32>
    %511 = arith.addf %490, %496 : vector<1x128xf32>
    %512 = arith.addf %502, %508 : vector<1x128xf32>
    %513 = arith.addf %509, %510 : vector<1x128xf32>
    %514 = arith.addf %511, %512 : vector<1x128xf32>
    %515 = arith.addf %513, %514 : vector<1x128xf32>
    %c8_i32_226 = arith.constant 8 : i32
    %516 = arith.addi %0, %c8_i32_226 : i32
    %c1_i32_227 = arith.constant 1 : i32
    %517 = arith.addi %516, %c1_i32_227 : i32
    %c8_i32_228 = arith.constant 8 : i32
    %518 = arith.muli %517, %c8_i32_228 : i32
    %c0_i32_229 = arith.constant 0 : i32
    %519 = arith.addi %518, %c0_i32_229 : i32
    %520 = arith.index_cast %519 : i32 to index
    %521 = memref.load %arg1[%520] : memref<128xi32, #tpu.memory_space<smem>>
    %522 = arith.index_cast %521 : i32 to index
    %c0_230 = arith.constant 0 : index
    %523 = vector.load %arg2[%522, %c0_230] : memref<128x128xf32, #tpu.memory_space<vmem>>, vector<1x128xf32>
    %c8_i32_231 = arith.constant 8 : i32
    %524 = arith.muli %517, %c8_i32_231 : i32
    %c1_i32_232 = arith.constant 1 : i32
    %525 = arith.addi %524, %c1_i32_232 : i32
    %526 = arith.index_cast %525 : i32 to index
    %527 = memref.load %arg1[%526] : memref<128xi32, #tpu.memory_space<smem>>
    %528 = arith.index_cast %527 : i32 to index
    %c0_233 = arith.constant 0 : index
    %529 = vector.load %arg2[%528, %c0_233] : memref<128x128xf32, #tpu.memory_space<vmem>>, vector<1x128xf32>
    %c8_i32_234 = arith.constant 8 : i32
    %530 = arith.muli %517, %c8_i32_234 : i32
    %c2_i32_235 = arith.constant 2 : i32
    %531 = arith.addi %530, %c2_i32_235 : i32
    %532 = arith.index_cast %531 : i32 to index
    %533 = memref.load %arg1[%532] : memref<128xi32, #tpu.memory_space<smem>>
    %534 = arith.index_cast %533 : i32 to index
    %c0_236 = arith.constant 0 : index
    %535 = vector.load %arg2[%534, %c0_236] : memref<128x128xf32, #tpu.memory_space<vmem>>, vector<1x128xf32>
    %c8_i32_237 = arith.constant 8 : i32
    %536 = arith.muli %517, %c8_i32_237 : i32
    %c3_i32_238 = arith.constant 3 : i32
    %537 = arith.addi %536, %c3_i32_238 : i32
    %538 = arith.index_cast %537 : i32 to index
    %539 = memref.load %arg1[%538] : memref<128xi32, #tpu.memory_space<smem>>
    %540 = arith.index_cast %539 : i32 to index
    %c0_239 = arith.constant 0 : index
    %541 = vector.load %arg2[%540, %c0_239] : memref<128x128xf32, #tpu.memory_space<vmem>>, vector<1x128xf32>
    %c8_i32_240 = arith.constant 8 : i32
    %542 = arith.muli %517, %c8_i32_240 : i32
    %c4_i32_241 = arith.constant 4 : i32
    %543 = arith.addi %542, %c4_i32_241 : i32
    %544 = arith.index_cast %543 : i32 to index
    %545 = memref.load %arg1[%544] : memref<128xi32, #tpu.memory_space<smem>>
    %546 = arith.index_cast %545 : i32 to index
    %c0_242 = arith.constant 0 : index
    %547 = vector.load %arg2[%546, %c0_242] : memref<128x128xf32, #tpu.memory_space<vmem>>, vector<1x128xf32>
    %c8_i32_243 = arith.constant 8 : i32
    %548 = arith.muli %517, %c8_i32_243 : i32
    %c5_i32_244 = arith.constant 5 : i32
    %549 = arith.addi %548, %c5_i32_244 : i32
    %550 = arith.index_cast %549 : i32 to index
    %551 = memref.load %arg1[%550] : memref<128xi32, #tpu.memory_space<smem>>
    %552 = arith.index_cast %551 : i32 to index
    %c0_245 = arith.constant 0 : index
    %553 = vector.load %arg2[%552, %c0_245] : memref<128x128xf32, #tpu.memory_space<vmem>>, vector<1x128xf32>
    %c8_i32_246 = arith.constant 8 : i32
    %554 = arith.muli %517, %c8_i32_246 : i32
    %c6_i32_247 = arith.constant 6 : i32
    %555 = arith.addi %554, %c6_i32_247 : i32
    %556 = arith.index_cast %555 : i32 to index
    %557 = memref.load %arg1[%556] : memref<128xi32, #tpu.memory_space<smem>>
    %558 = arith.index_cast %557 : i32 to index
    %c0_248 = arith.constant 0 : index
    %559 = vector.load %arg2[%558, %c0_248] : memref<128x128xf32, #tpu.memory_space<vmem>>, vector<1x128xf32>
    %c8_i32_249 = arith.constant 8 : i32
    %560 = arith.muli %517, %c8_i32_249 : i32
    %c7_i32_250 = arith.constant 7 : i32
    %561 = arith.addi %560, %c7_i32_250 : i32
    %562 = arith.index_cast %561 : i32 to index
    %563 = memref.load %arg1[%562] : memref<128xi32, #tpu.memory_space<smem>>
    %564 = arith.index_cast %563 : i32 to index
    %c0_251 = arith.constant 0 : index
    %565 = vector.load %arg2[%564, %c0_251] : memref<128x128xf32, #tpu.memory_space<vmem>>, vector<1x128xf32>
    %566 = arith.addf %523, %529 : vector<1x128xf32>
    %567 = arith.addf %535, %541 : vector<1x128xf32>
    %568 = arith.addf %547, %553 : vector<1x128xf32>
    %569 = arith.addf %559, %565 : vector<1x128xf32>
    %570 = arith.addf %566, %567 : vector<1x128xf32>
    %571 = arith.addf %568, %569 : vector<1x128xf32>
    %572 = arith.addf %570, %571 : vector<1x128xf32>
    %c8_i32_252 = arith.constant 8 : i32
    %573 = arith.addi %0, %c8_i32_252 : i32
    %c2_i32_253 = arith.constant 2 : i32
    %574 = arith.addi %573, %c2_i32_253 : i32
    %c8_i32_254 = arith.constant 8 : i32
    %575 = arith.muli %574, %c8_i32_254 : i32
    %c0_i32_255 = arith.constant 0 : i32
    %576 = arith.addi %575, %c0_i32_255 : i32
    %577 = arith.index_cast %576 : i32 to index
    %578 = memref.load %arg1[%577] : memref<128xi32, #tpu.memory_space<smem>>
    %579 = arith.index_cast %578 : i32 to index
    %c0_256 = arith.constant 0 : index
    %580 = vector.load %arg2[%579, %c0_256] : memref<128x128xf32, #tpu.memory_space<vmem>>, vector<1x128xf32>
    %c8_i32_257 = arith.constant 8 : i32
    %581 = arith.muli %574, %c8_i32_257 : i32
    %c1_i32_258 = arith.constant 1 : i32
    %582 = arith.addi %581, %c1_i32_258 : i32
    %583 = arith.index_cast %582 : i32 to index
    %584 = memref.load %arg1[%583] : memref<128xi32, #tpu.memory_space<smem>>
    %585 = arith.index_cast %584 : i32 to index
    %c0_259 = arith.constant 0 : index
    %586 = vector.load %arg2[%585, %c0_259] : memref<128x128xf32, #tpu.memory_space<vmem>>, vector<1x128xf32>
    %c8_i32_260 = arith.constant 8 : i32
    %587 = arith.muli %574, %c8_i32_260 : i32
    %c2_i32_261 = arith.constant 2 : i32
    %588 = arith.addi %587, %c2_i32_261 : i32
    %589 = arith.index_cast %588 : i32 to index
    %590 = memref.load %arg1[%589] : memref<128xi32, #tpu.memory_space<smem>>
    %591 = arith.index_cast %590 : i32 to index
    %c0_262 = arith.constant 0 : index
    %592 = vector.load %arg2[%591, %c0_262] : memref<128x128xf32, #tpu.memory_space<vmem>>, vector<1x128xf32>
    %c8_i32_263 = arith.constant 8 : i32
    %593 = arith.muli %574, %c8_i32_263 : i32
    %c3_i32_264 = arith.constant 3 : i32
    %594 = arith.addi %593, %c3_i32_264 : i32
    %595 = arith.index_cast %594 : i32 to index
    %596 = memref.load %arg1[%595] : memref<128xi32, #tpu.memory_space<smem>>
    %597 = arith.index_cast %596 : i32 to index
    %c0_265 = arith.constant 0 : index
    %598 = vector.load %arg2[%597, %c0_265] : memref<128x128xf32, #tpu.memory_space<vmem>>, vector<1x128xf32>
    %c8_i32_266 = arith.constant 8 : i32
    %599 = arith.muli %574, %c8_i32_266 : i32
    %c4_i32_267 = arith.constant 4 : i32
    %600 = arith.addi %599, %c4_i32_267 : i32
    %601 = arith.index_cast %600 : i32 to index
    %602 = memref.load %arg1[%601] : memref<128xi32, #tpu.memory_space<smem>>
    %603 = arith.index_cast %602 : i32 to index
    %c0_268 = arith.constant 0 : index
    %604 = vector.load %arg2[%603, %c0_268] : memref<128x128xf32, #tpu.memory_space<vmem>>, vector<1x128xf32>
    %c8_i32_269 = arith.constant 8 : i32
    %605 = arith.muli %574, %c8_i32_269 : i32
    %c5_i32_270 = arith.constant 5 : i32
    %606 = arith.addi %605, %c5_i32_270 : i32
    %607 = arith.index_cast %606 : i32 to index
    %608 = memref.load %arg1[%607] : memref<128xi32, #tpu.memory_space<smem>>
    %609 = arith.index_cast %608 : i32 to index
    %c0_271 = arith.constant 0 : index
    %610 = vector.load %arg2[%609, %c0_271] : memref<128x128xf32, #tpu.memory_space<vmem>>, vector<1x128xf32>
    %c8_i32_272 = arith.constant 8 : i32
    %611 = arith.muli %574, %c8_i32_272 : i32
    %c6_i32_273 = arith.constant 6 : i32
    %612 = arith.addi %611, %c6_i32_273 : i32
    %613 = arith.index_cast %612 : i32 to index
    %614 = memref.load %arg1[%613] : memref<128xi32, #tpu.memory_space<smem>>
    %615 = arith.index_cast %614 : i32 to index
    %c0_274 = arith.constant 0 : index
    %616 = vector.load %arg2[%615, %c0_274] : memref<128x128xf32, #tpu.memory_space<vmem>>, vector<1x128xf32>
    %c8_i32_275 = arith.constant 8 : i32
    %617 = arith.muli %574, %c8_i32_275 : i32
    %c7_i32_276 = arith.constant 7 : i32
    %618 = arith.addi %617, %c7_i32_276 : i32
    %619 = arith.index_cast %618 : i32 to index
    %620 = memref.load %arg1[%619] : memref<128xi32, #tpu.memory_space<smem>>
    %621 = arith.index_cast %620 : i32 to index
    %c0_277 = arith.constant 0 : index
    %622 = vector.load %arg2[%621, %c0_277] : memref<128x128xf32, #tpu.memory_space<vmem>>, vector<1x128xf32>
    %623 = arith.addf %580, %586 : vector<1x128xf32>
    %624 = arith.addf %592, %598 : vector<1x128xf32>
    %625 = arith.addf %604, %610 : vector<1x128xf32>
    %626 = arith.addf %616, %622 : vector<1x128xf32>
    %627 = arith.addf %623, %624 : vector<1x128xf32>
    %628 = arith.addf %625, %626 : vector<1x128xf32>
    %629 = arith.addf %627, %628 : vector<1x128xf32>
    %c8_i32_278 = arith.constant 8 : i32
    %630 = arith.addi %0, %c8_i32_278 : i32
    %c3_i32_279 = arith.constant 3 : i32
    %631 = arith.addi %630, %c3_i32_279 : i32
    %c8_i32_280 = arith.constant 8 : i32
    %632 = arith.muli %631, %c8_i32_280 : i32
    %c0_i32_281 = arith.constant 0 : i32
    %633 = arith.addi %632, %c0_i32_281 : i32
    %634 = arith.index_cast %633 : i32 to index
    %635 = memref.load %arg1[%634] : memref<128xi32, #tpu.memory_space<smem>>
    %636 = arith.index_cast %635 : i32 to index
    %c0_282 = arith.constant 0 : index
    %637 = vector.load %arg2[%636, %c0_282] : memref<128x128xf32, #tpu.memory_space<vmem>>, vector<1x128xf32>
    %c8_i32_283 = arith.constant 8 : i32
    %638 = arith.muli %631, %c8_i32_283 : i32
    %c1_i32_284 = arith.constant 1 : i32
    %639 = arith.addi %638, %c1_i32_284 : i32
    %640 = arith.index_cast %639 : i32 to index
    %641 = memref.load %arg1[%640] : memref<128xi32, #tpu.memory_space<smem>>
    %642 = arith.index_cast %641 : i32 to index
    %c0_285 = arith.constant 0 : index
    %643 = vector.load %arg2[%642, %c0_285] : memref<128x128xf32, #tpu.memory_space<vmem>>, vector<1x128xf32>
    %c8_i32_286 = arith.constant 8 : i32
    %644 = arith.muli %631, %c8_i32_286 : i32
    %c2_i32_287 = arith.constant 2 : i32
    %645 = arith.addi %644, %c2_i32_287 : i32
    %646 = arith.index_cast %645 : i32 to index
    %647 = memref.load %arg1[%646] : memref<128xi32, #tpu.memory_space<smem>>
    %648 = arith.index_cast %647 : i32 to index
    %c0_288 = arith.constant 0 : index
    %649 = vector.load %arg2[%648, %c0_288] : memref<128x128xf32, #tpu.memory_space<vmem>>, vector<1x128xf32>
    %c8_i32_289 = arith.constant 8 : i32
    %650 = arith.muli %631, %c8_i32_289 : i32
    %c3_i32_290 = arith.constant 3 : i32
    %651 = arith.addi %650, %c3_i32_290 : i32
    %652 = arith.index_cast %651 : i32 to index
    %653 = memref.load %arg1[%652] : memref<128xi32, #tpu.memory_space<smem>>
    %654 = arith.index_cast %653 : i32 to index
    %c0_291 = arith.constant 0 : index
    %655 = vector.load %arg2[%654, %c0_291] : memref<128x128xf32, #tpu.memory_space<vmem>>, vector<1x128xf32>
    %c8_i32_292 = arith.constant 8 : i32
    %656 = arith.muli %631, %c8_i32_292 : i32
    %c4_i32_293 = arith.constant 4 : i32
    %657 = arith.addi %656, %c4_i32_293 : i32
    %658 = arith.index_cast %657 : i32 to index
    %659 = memref.load %arg1[%658] : memref<128xi32, #tpu.memory_space<smem>>
    %660 = arith.index_cast %659 : i32 to index
    %c0_294 = arith.constant 0 : index
    %661 = vector.load %arg2[%660, %c0_294] : memref<128x128xf32, #tpu.memory_space<vmem>>, vector<1x128xf32>
    %c8_i32_295 = arith.constant 8 : i32
    %662 = arith.muli %631, %c8_i32_295 : i32
    %c5_i32_296 = arith.constant 5 : i32
    %663 = arith.addi %662, %c5_i32_296 : i32
    %664 = arith.index_cast %663 : i32 to index
    %665 = memref.load %arg1[%664] : memref<128xi32, #tpu.memory_space<smem>>
    %666 = arith.index_cast %665 : i32 to index
    %c0_297 = arith.constant 0 : index
    %667 = vector.load %arg2[%666, %c0_297] : memref<128x128xf32, #tpu.memory_space<vmem>>, vector<1x128xf32>
    %c8_i32_298 = arith.constant 8 : i32
    %668 = arith.muli %631, %c8_i32_298 : i32
    %c6_i32_299 = arith.constant 6 : i32
    %669 = arith.addi %668, %c6_i32_299 : i32
    %670 = arith.index_cast %669 : i32 to index
    %671 = memref.load %arg1[%670] : memref<128xi32, #tpu.memory_space<smem>>
    %672 = arith.index_cast %671 : i32 to index
    %c0_300 = arith.constant 0 : index
    %673 = vector.load %arg2[%672, %c0_300] : memref<128x128xf32, #tpu.memory_space<vmem>>, vector<1x128xf32>
    %c8_i32_301 = arith.constant 8 : i32
    %674 = arith.muli %631, %c8_i32_301 : i32
    %c7_i32_302 = arith.constant 7 : i32
    %675 = arith.addi %674, %c7_i32_302 : i32
    %676 = arith.index_cast %675 : i32 to index
    %677 = memref.load %arg1[%676] : memref<128xi32, #tpu.memory_space<smem>>
    %678 = arith.index_cast %677 : i32 to index
    %c0_303 = arith.constant 0 : index
    %679 = vector.load %arg2[%678, %c0_303] : memref<128x128xf32, #tpu.memory_space<vmem>>, vector<1x128xf32>
    %680 = arith.addf %637, %643 : vector<1x128xf32>
    %681 = arith.addf %649, %655 : vector<1x128xf32>
    %682 = arith.addf %661, %667 : vector<1x128xf32>
    %683 = arith.addf %673, %679 : vector<1x128xf32>
    %684 = arith.addf %680, %681 : vector<1x128xf32>
    %685 = arith.addf %682, %683 : vector<1x128xf32>
    %686 = arith.addf %684, %685 : vector<1x128xf32>
    %c8_i32_304 = arith.constant 8 : i32
    %687 = arith.addi %0, %c8_i32_304 : i32
    %c4_i32_305 = arith.constant 4 : i32
    %688 = arith.addi %687, %c4_i32_305 : i32
    %c8_i32_306 = arith.constant 8 : i32
    %689 = arith.muli %688, %c8_i32_306 : i32
    %c0_i32_307 = arith.constant 0 : i32
    %690 = arith.addi %689, %c0_i32_307 : i32
    %691 = arith.index_cast %690 : i32 to index
    %692 = memref.load %arg1[%691] : memref<128xi32, #tpu.memory_space<smem>>
    %693 = arith.index_cast %692 : i32 to index
    %c0_308 = arith.constant 0 : index
    %694 = vector.load %arg2[%693, %c0_308] : memref<128x128xf32, #tpu.memory_space<vmem>>, vector<1x128xf32>
    %c8_i32_309 = arith.constant 8 : i32
    %695 = arith.muli %688, %c8_i32_309 : i32
    %c1_i32_310 = arith.constant 1 : i32
    %696 = arith.addi %695, %c1_i32_310 : i32
    %697 = arith.index_cast %696 : i32 to index
    %698 = memref.load %arg1[%697] : memref<128xi32, #tpu.memory_space<smem>>
    %699 = arith.index_cast %698 : i32 to index
    %c0_311 = arith.constant 0 : index
    %700 = vector.load %arg2[%699, %c0_311] : memref<128x128xf32, #tpu.memory_space<vmem>>, vector<1x128xf32>
    %c8_i32_312 = arith.constant 8 : i32
    %701 = arith.muli %688, %c8_i32_312 : i32
    %c2_i32_313 = arith.constant 2 : i32
    %702 = arith.addi %701, %c2_i32_313 : i32
    %703 = arith.index_cast %702 : i32 to index
    %704 = memref.load %arg1[%703] : memref<128xi32, #tpu.memory_space<smem>>
    %705 = arith.index_cast %704 : i32 to index
    %c0_314 = arith.constant 0 : index
    %706 = vector.load %arg2[%705, %c0_314] : memref<128x128xf32, #tpu.memory_space<vmem>>, vector<1x128xf32>
    %c8_i32_315 = arith.constant 8 : i32
    %707 = arith.muli %688, %c8_i32_315 : i32
    %c3_i32_316 = arith.constant 3 : i32
    %708 = arith.addi %707, %c3_i32_316 : i32
    %709 = arith.index_cast %708 : i32 to index
    %710 = memref.load %arg1[%709] : memref<128xi32, #tpu.memory_space<smem>>
    %711 = arith.index_cast %710 : i32 to index
    %c0_317 = arith.constant 0 : index
    %712 = vector.load %arg2[%711, %c0_317] : memref<128x128xf32, #tpu.memory_space<vmem>>, vector<1x128xf32>
    %c8_i32_318 = arith.constant 8 : i32
    %713 = arith.muli %688, %c8_i32_318 : i32
    %c4_i32_319 = arith.constant 4 : i32
    %714 = arith.addi %713, %c4_i32_319 : i32
    %715 = arith.index_cast %714 : i32 to index
    %716 = memref.load %arg1[%715] : memref<128xi32, #tpu.memory_space<smem>>
    %717 = arith.index_cast %716 : i32 to index
    %c0_320 = arith.constant 0 : index
    %718 = vector.load %arg2[%717, %c0_320] : memref<128x128xf32, #tpu.memory_space<vmem>>, vector<1x128xf32>
    %c8_i32_321 = arith.constant 8 : i32
    %719 = arith.muli %688, %c8_i32_321 : i32
    %c5_i32_322 = arith.constant 5 : i32
    %720 = arith.addi %719, %c5_i32_322 : i32
    %721 = arith.index_cast %720 : i32 to index
    %722 = memref.load %arg1[%721] : memref<128xi32, #tpu.memory_space<smem>>
    %723 = arith.index_cast %722 : i32 to index
    %c0_323 = arith.constant 0 : index
    %724 = vector.load %arg2[%723, %c0_323] : memref<128x128xf32, #tpu.memory_space<vmem>>, vector<1x128xf32>
    %c8_i32_324 = arith.constant 8 : i32
    %725 = arith.muli %688, %c8_i32_324 : i32
    %c6_i32_325 = arith.constant 6 : i32
    %726 = arith.addi %725, %c6_i32_325 : i32
    %727 = arith.index_cast %726 : i32 to index
    %728 = memref.load %arg1[%727] : memref<128xi32, #tpu.memory_space<smem>>
    %729 = arith.index_cast %728 : i32 to index
    %c0_326 = arith.constant 0 : index
    %730 = vector.load %arg2[%729, %c0_326] : memref<128x128xf32, #tpu.memory_space<vmem>>, vector<1x128xf32>
    %c8_i32_327 = arith.constant 8 : i32
    %731 = arith.muli %688, %c8_i32_327 : i32
    %c7_i32_328 = arith.constant 7 : i32
    %732 = arith.addi %731, %c7_i32_328 : i32
    %733 = arith.index_cast %732 : i32 to index
    %734 = memref.load %arg1[%733] : memref<128xi32, #tpu.memory_space<smem>>
    %735 = arith.index_cast %734 : i32 to index
    %c0_329 = arith.constant 0 : index
    %736 = vector.load %arg2[%735, %c0_329] : memref<128x128xf32, #tpu.memory_space<vmem>>, vector<1x128xf32>
    %737 = arith.addf %694, %700 : vector<1x128xf32>
    %738 = arith.addf %706, %712 : vector<1x128xf32>
    %739 = arith.addf %718, %724 : vector<1x128xf32>
    %740 = arith.addf %730, %736 : vector<1x128xf32>
    %741 = arith.addf %737, %738 : vector<1x128xf32>
    %742 = arith.addf %739, %740 : vector<1x128xf32>
    %743 = arith.addf %741, %742 : vector<1x128xf32>
    %c8_i32_330 = arith.constant 8 : i32
    %744 = arith.addi %0, %c8_i32_330 : i32
    %c5_i32_331 = arith.constant 5 : i32
    %745 = arith.addi %744, %c5_i32_331 : i32
    %c8_i32_332 = arith.constant 8 : i32
    %746 = arith.muli %745, %c8_i32_332 : i32
    %c0_i32_333 = arith.constant 0 : i32
    %747 = arith.addi %746, %c0_i32_333 : i32
    %748 = arith.index_cast %747 : i32 to index
    %749 = memref.load %arg1[%748] : memref<128xi32, #tpu.memory_space<smem>>
    %750 = arith.index_cast %749 : i32 to index
    %c0_334 = arith.constant 0 : index
    %751 = vector.load %arg2[%750, %c0_334] : memref<128x128xf32, #tpu.memory_space<vmem>>, vector<1x128xf32>
    %c8_i32_335 = arith.constant 8 : i32
    %752 = arith.muli %745, %c8_i32_335 : i32
    %c1_i32_336 = arith.constant 1 : i32
    %753 = arith.addi %752, %c1_i32_336 : i32
    %754 = arith.index_cast %753 : i32 to index
    %755 = memref.load %arg1[%754] : memref<128xi32, #tpu.memory_space<smem>>
    %756 = arith.index_cast %755 : i32 to index
    %c0_337 = arith.constant 0 : index
    %757 = vector.load %arg2[%756, %c0_337] : memref<128x128xf32, #tpu.memory_space<vmem>>, vector<1x128xf32>
    %c8_i32_338 = arith.constant 8 : i32
    %758 = arith.muli %745, %c8_i32_338 : i32
    %c2_i32_339 = arith.constant 2 : i32
    %759 = arith.addi %758, %c2_i32_339 : i32
    %760 = arith.index_cast %759 : i32 to index
    %761 = memref.load %arg1[%760] : memref<128xi32, #tpu.memory_space<smem>>
    %762 = arith.index_cast %761 : i32 to index
    %c0_340 = arith.constant 0 : index
    %763 = vector.load %arg2[%762, %c0_340] : memref<128x128xf32, #tpu.memory_space<vmem>>, vector<1x128xf32>
    %c8_i32_341 = arith.constant 8 : i32
    %764 = arith.muli %745, %c8_i32_341 : i32
    %c3_i32_342 = arith.constant 3 : i32
    %765 = arith.addi %764, %c3_i32_342 : i32
    %766 = arith.index_cast %765 : i32 to index
    %767 = memref.load %arg1[%766] : memref<128xi32, #tpu.memory_space<smem>>
    %768 = arith.index_cast %767 : i32 to index
    %c0_343 = arith.constant 0 : index
    %769 = vector.load %arg2[%768, %c0_343] : memref<128x128xf32, #tpu.memory_space<vmem>>, vector<1x128xf32>
    %c8_i32_344 = arith.constant 8 : i32
    %770 = arith.muli %745, %c8_i32_344 : i32
    %c4_i32_345 = arith.constant 4 : i32
    %771 = arith.addi %770, %c4_i32_345 : i32
    %772 = arith.index_cast %771 : i32 to index
    %773 = memref.load %arg1[%772] : memref<128xi32, #tpu.memory_space<smem>>
    %774 = arith.index_cast %773 : i32 to index
    %c0_346 = arith.constant 0 : index
    %775 = vector.load %arg2[%774, %c0_346] : memref<128x128xf32, #tpu.memory_space<vmem>>, vector<1x128xf32>
    %c8_i32_347 = arith.constant 8 : i32
    %776 = arith.muli %745, %c8_i32_347 : i32
    %c5_i32_348 = arith.constant 5 : i32
    %777 = arith.addi %776, %c5_i32_348 : i32
    %778 = arith.index_cast %777 : i32 to index
    %779 = memref.load %arg1[%778] : memref<128xi32, #tpu.memory_space<smem>>
    %780 = arith.index_cast %779 : i32 to index
    %c0_349 = arith.constant 0 : index
    %781 = vector.load %arg2[%780, %c0_349] : memref<128x128xf32, #tpu.memory_space<vmem>>, vector<1x128xf32>
    %c8_i32_350 = arith.constant 8 : i32
    %782 = arith.muli %745, %c8_i32_350 : i32
    %c6_i32_351 = arith.constant 6 : i32
    %783 = arith.addi %782, %c6_i32_351 : i32
    %784 = arith.index_cast %783 : i32 to index
    %785 = memref.load %arg1[%784] : memref<128xi32, #tpu.memory_space<smem>>
    %786 = arith.index_cast %785 : i32 to index
    %c0_352 = arith.constant 0 : index
    %787 = vector.load %arg2[%786, %c0_352] : memref<128x128xf32, #tpu.memory_space<vmem>>, vector<1x128xf32>
    %c8_i32_353 = arith.constant 8 : i32
    %788 = arith.muli %745, %c8_i32_353 : i32
    %c7_i32_354 = arith.constant 7 : i32
    %789 = arith.addi %788, %c7_i32_354 : i32
    %790 = arith.index_cast %789 : i32 to index
    %791 = memref.load %arg1[%790] : memref<128xi32, #tpu.memory_space<smem>>
    %792 = arith.index_cast %791 : i32 to index
    %c0_355 = arith.constant 0 : index
    %793 = vector.load %arg2[%792, %c0_355] : memref<128x128xf32, #tpu.memory_space<vmem>>, vector<1x128xf32>
    %794 = arith.addf %751, %757 : vector<1x128xf32>
    %795 = arith.addf %763, %769 : vector<1x128xf32>
    %796 = arith.addf %775, %781 : vector<1x128xf32>
    %797 = arith.addf %787, %793 : vector<1x128xf32>
    %798 = arith.addf %794, %795 : vector<1x128xf32>
    %799 = arith.addf %796, %797 : vector<1x128xf32>
    %800 = arith.addf %798, %799 : vector<1x128xf32>
    %c8_i32_356 = arith.constant 8 : i32
    %801 = arith.addi %0, %c8_i32_356 : i32
    %c6_i32_357 = arith.constant 6 : i32
    %802 = arith.addi %801, %c6_i32_357 : i32
    %c8_i32_358 = arith.constant 8 : i32
    %803 = arith.muli %802, %c8_i32_358 : i32
    %c0_i32_359 = arith.constant 0 : i32
    %804 = arith.addi %803, %c0_i32_359 : i32
    %805 = arith.index_cast %804 : i32 to index
    %806 = memref.load %arg1[%805] : memref<128xi32, #tpu.memory_space<smem>>
    %807 = arith.index_cast %806 : i32 to index
    %c0_360 = arith.constant 0 : index
    %808 = vector.load %arg2[%807, %c0_360] : memref<128x128xf32, #tpu.memory_space<vmem>>, vector<1x128xf32>
    %c8_i32_361 = arith.constant 8 : i32
    %809 = arith.muli %802, %c8_i32_361 : i32
    %c1_i32_362 = arith.constant 1 : i32
    %810 = arith.addi %809, %c1_i32_362 : i32
    %811 = arith.index_cast %810 : i32 to index
    %812 = memref.load %arg1[%811] : memref<128xi32, #tpu.memory_space<smem>>
    %813 = arith.index_cast %812 : i32 to index
    %c0_363 = arith.constant 0 : index
    %814 = vector.load %arg2[%813, %c0_363] : memref<128x128xf32, #tpu.memory_space<vmem>>, vector<1x128xf32>
    %c8_i32_364 = arith.constant 8 : i32
    %815 = arith.muli %802, %c8_i32_364 : i32
    %c2_i32_365 = arith.constant 2 : i32
    %816 = arith.addi %815, %c2_i32_365 : i32
    %817 = arith.index_cast %816 : i32 to index
    %818 = memref.load %arg1[%817] : memref<128xi32, #tpu.memory_space<smem>>
    %819 = arith.index_cast %818 : i32 to index
    %c0_366 = arith.constant 0 : index
    %820 = vector.load %arg2[%819, %c0_366] : memref<128x128xf32, #tpu.memory_space<vmem>>, vector<1x128xf32>
    %c8_i32_367 = arith.constant 8 : i32
    %821 = arith.muli %802, %c8_i32_367 : i32
    %c3_i32_368 = arith.constant 3 : i32
    %822 = arith.addi %821, %c3_i32_368 : i32
    %823 = arith.index_cast %822 : i32 to index
    %824 = memref.load %arg1[%823] : memref<128xi32, #tpu.memory_space<smem>>
    %825 = arith.index_cast %824 : i32 to index
    %c0_369 = arith.constant 0 : index
    %826 = vector.load %arg2[%825, %c0_369] : memref<128x128xf32, #tpu.memory_space<vmem>>, vector<1x128xf32>
    %c8_i32_370 = arith.constant 8 : i32
    %827 = arith.muli %802, %c8_i32_370 : i32
    %c4_i32_371 = arith.constant 4 : i32
    %828 = arith.addi %827, %c4_i32_371 : i32
    %829 = arith.index_cast %828 : i32 to index
    %830 = memref.load %arg1[%829] : memref<128xi32, #tpu.memory_space<smem>>
    %831 = arith.index_cast %830 : i32 to index
    %c0_372 = arith.constant 0 : index
    %832 = vector.load %arg2[%831, %c0_372] : memref<128x128xf32, #tpu.memory_space<vmem>>, vector<1x128xf32>
    %c8_i32_373 = arith.constant 8 : i32
    %833 = arith.muli %802, %c8_i32_373 : i32
    %c5_i32_374 = arith.constant 5 : i32
    %834 = arith.addi %833, %c5_i32_374 : i32
    %835 = arith.index_cast %834 : i32 to index
    %836 = memref.load %arg1[%835] : memref<128xi32, #tpu.memory_space<smem>>
    %837 = arith.index_cast %836 : i32 to index
    %c0_375 = arith.constant 0 : index
    %838 = vector.load %arg2[%837, %c0_375] : memref<128x128xf32, #tpu.memory_space<vmem>>, vector<1x128xf32>
    %c8_i32_376 = arith.constant 8 : i32
    %839 = arith.muli %802, %c8_i32_376 : i32
    %c6_i32_377 = arith.constant 6 : i32
    %840 = arith.addi %839, %c6_i32_377 : i32
    %841 = arith.index_cast %840 : i32 to index
    %842 = memref.load %arg1[%841] : memref<128xi32, #tpu.memory_space<smem>>
    %843 = arith.index_cast %842 : i32 to index
    %c0_378 = arith.constant 0 : index
    %844 = vector.load %arg2[%843, %c0_378] : memref<128x128xf32, #tpu.memory_space<vmem>>, vector<1x128xf32>
    %c8_i32_379 = arith.constant 8 : i32
    %845 = arith.muli %802, %c8_i32_379 : i32
    %c7_i32_380 = arith.constant 7 : i32
    %846 = arith.addi %845, %c7_i32_380 : i32
    %847 = arith.index_cast %846 : i32 to index
    %848 = memref.load %arg1[%847] : memref<128xi32, #tpu.memory_space<smem>>
    %849 = arith.index_cast %848 : i32 to index
    %c0_381 = arith.constant 0 : index
    %850 = vector.load %arg2[%849, %c0_381] : memref<128x128xf32, #tpu.memory_space<vmem>>, vector<1x128xf32>
    %851 = arith.addf %808, %814 : vector<1x128xf32>
    %852 = arith.addf %820, %826 : vector<1x128xf32>
    %853 = arith.addf %832, %838 : vector<1x128xf32>
    %854 = arith.addf %844, %850 : vector<1x128xf32>
    %855 = arith.addf %851, %852 : vector<1x128xf32>
    %856 = arith.addf %853, %854 : vector<1x128xf32>
    %857 = arith.addf %855, %856 : vector<1x128xf32>
    %c8_i32_382 = arith.constant 8 : i32
    %858 = arith.addi %0, %c8_i32_382 : i32
    %c7_i32_383 = arith.constant 7 : i32
    %859 = arith.addi %858, %c7_i32_383 : i32
    %c8_i32_384 = arith.constant 8 : i32
    %860 = arith.muli %859, %c8_i32_384 : i32
    %c0_i32_385 = arith.constant 0 : i32
    %861 = arith.addi %860, %c0_i32_385 : i32
    %862 = arith.index_cast %861 : i32 to index
    %863 = memref.load %arg1[%862] : memref<128xi32, #tpu.memory_space<smem>>
    %864 = arith.index_cast %863 : i32 to index
    %c0_386 = arith.constant 0 : index
    %865 = vector.load %arg2[%864, %c0_386] : memref<128x128xf32, #tpu.memory_space<vmem>>, vector<1x128xf32>
    %c8_i32_387 = arith.constant 8 : i32
    %866 = arith.muli %859, %c8_i32_387 : i32
    %c1_i32_388 = arith.constant 1 : i32
    %867 = arith.addi %866, %c1_i32_388 : i32
    %868 = arith.index_cast %867 : i32 to index
    %869 = memref.load %arg1[%868] : memref<128xi32, #tpu.memory_space<smem>>
    %870 = arith.index_cast %869 : i32 to index
    %c0_389 = arith.constant 0 : index
    %871 = vector.load %arg2[%870, %c0_389] : memref<128x128xf32, #tpu.memory_space<vmem>>, vector<1x128xf32>
    %c8_i32_390 = arith.constant 8 : i32
    %872 = arith.muli %859, %c8_i32_390 : i32
    %c2_i32_391 = arith.constant 2 : i32
    %873 = arith.addi %872, %c2_i32_391 : i32
    %874 = arith.index_cast %873 : i32 to index
    %875 = memref.load %arg1[%874] : memref<128xi32, #tpu.memory_space<smem>>
    %876 = arith.index_cast %875 : i32 to index
    %c0_392 = arith.constant 0 : index
    %877 = vector.load %arg2[%876, %c0_392] : memref<128x128xf32, #tpu.memory_space<vmem>>, vector<1x128xf32>
    %c8_i32_393 = arith.constant 8 : i32
    %878 = arith.muli %859, %c8_i32_393 : i32
    %c3_i32_394 = arith.constant 3 : i32
    %879 = arith.addi %878, %c3_i32_394 : i32
    %880 = arith.index_cast %879 : i32 to index
    %881 = memref.load %arg1[%880] : memref<128xi32, #tpu.memory_space<smem>>
    %882 = arith.index_cast %881 : i32 to index
    %c0_395 = arith.constant 0 : index
    %883 = vector.load %arg2[%882, %c0_395] : memref<128x128xf32, #tpu.memory_space<vmem>>, vector<1x128xf32>
    %c8_i32_396 = arith.constant 8 : i32
    %884 = arith.muli %859, %c8_i32_396 : i32
    %c4_i32_397 = arith.constant 4 : i32
    %885 = arith.addi %884, %c4_i32_397 : i32
    %886 = arith.index_cast %885 : i32 to index
    %887 = memref.load %arg1[%886] : memref<128xi32, #tpu.memory_space<smem>>
    %888 = arith.index_cast %887 : i32 to index
    %c0_398 = arith.constant 0 : index
    %889 = vector.load %arg2[%888, %c0_398] : memref<128x128xf32, #tpu.memory_space<vmem>>, vector<1x128xf32>
    %c8_i32_399 = arith.constant 8 : i32
    %890 = arith.muli %859, %c8_i32_399 : i32
    %c5_i32_400 = arith.constant 5 : i32
    %891 = arith.addi %890, %c5_i32_400 : i32
    %892 = arith.index_cast %891 : i32 to index
    %893 = memref.load %arg1[%892] : memref<128xi32, #tpu.memory_space<smem>>
    %894 = arith.index_cast %893 : i32 to index
    %c0_401 = arith.constant 0 : index
    %895 = vector.load %arg2[%894, %c0_401] : memref<128x128xf32, #tpu.memory_space<vmem>>, vector<1x128xf32>
    %c8_i32_402 = arith.constant 8 : i32
    %896 = arith.muli %859, %c8_i32_402 : i32
    %c6_i32_403 = arith.constant 6 : i32
    %897 = arith.addi %896, %c6_i32_403 : i32
    %898 = arith.index_cast %897 : i32 to index
    %899 = memref.load %arg1[%898] : memref<128xi32, #tpu.memory_space<smem>>
    %900 = arith.index_cast %899 : i32 to index
    %c0_404 = arith.constant 0 : index
    %901 = vector.load %arg2[%900, %c0_404] : memref<128x128xf32, #tpu.memory_space<vmem>>, vector<1x128xf32>
    %c8_i32_405 = arith.constant 8 : i32
    %902 = arith.muli %859, %c8_i32_405 : i32
    %c7_i32_406 = arith.constant 7 : i32
    %903 = arith.addi %902, %c7_i32_406 : i32
    %904 = arith.index_cast %903 : i32 to index
    %905 = memref.load %arg1[%904] : memref<128xi32, #tpu.memory_space<smem>>
    %906 = arith.index_cast %905 : i32 to index
    %c0_407 = arith.constant 0 : index
    %907 = vector.load %arg2[%906, %c0_407] : memref<128x128xf32, #tpu.memory_space<vmem>>, vector<1x128xf32>
    %908 = arith.addf %865, %871 : vector<1x128xf32>
    %909 = arith.addf %877, %883 : vector<1x128xf32>
    %910 = arith.addf %889, %895 : vector<1x128xf32>
    %911 = arith.addf %901, %907 : vector<1x128xf32>
    %912 = arith.addf %908, %909 : vector<1x128xf32>
    %913 = arith.addf %910, %911 : vector<1x128xf32>
    %914 = arith.addf %912, %913 : vector<1x128xf32>
    %915 = tpu.concatenate %515, %572, %629, %686, %743, %800, %857, %914 in 0 : vector<1x128xf32>, vector<1x128xf32>, vector<1x128xf32>, vector<1x128xf32>, vector<1x128xf32>, vector<1x128xf32>, vector<1x128xf32>, vector<1x128xf32> -> vector<8x128xf32>
    %c8 = arith.constant 8 : index
    %c0_408 = arith.constant 0 : index
    %916 = vector.load %arg10[%c8, %c0_408] : memref<16x128xf32, #tpu.memory_space<vmem>>, vector<8x128xf32>
    tpu.vector_store %arg10[%c8, %c0_408], %915 {strides = array<i32>} : memref<16x128xf32, #tpu.memory_space<vmem>>, vector<8x128xf32>,
    %c0_409 = arith.constant 0 : index
    %c0_410 = arith.constant 0 : index
    %917 = vector.load %arg10[%c0_409, %c0_410] : memref<16x128xf32, #tpu.memory_space<vmem>>, vector<16x128xf32>
    %c0_411 = arith.constant 0 : index
    %c0_412 = arith.constant 0 : index
    %918 = vector.load %arg3[%c0_411, %c0_412] : memref<128x128xbf16, #tpu.memory_space<vmem>>, vector<128x128xbf16>
    %c0_413 = arith.constant 0 : index
    %c0_414 = arith.constant 0 : index
    %919 = vector.load %arg4[%c0_413, %c0_414] : memref<1x128xf32, #tpu.memory_space<vmem>>, vector<1x128xf32>
    %920 = arith.truncf %917 : vector<16x128xf32> to vector<16x128xbf16>
    %cst = arith.constant dense<0.000000e+00> : vector<16x128xf32>
    %921 = tpu.matmul %920, %918, %cst {dimension_numbers = #tpu.dot_dimension_numbers<[1], [0], [0], [1], [0, 0, 1, 1], [], []>} : vector<16x128xbf16>, vector<128x128xbf16>, vector<16x128xf32> -> vector<16x128xf32>
    %922 = vector.broadcast %919 : vector<1x128xf32> to vector<16x128xf32>
    %923 = arith.addf %921, %922 : vector<16x128xf32>
    %cst_415 = arith.constant 0.000000e+00 : f32
    %924 = vector.broadcast %cst_415 : f32 to vector<16x128xf32>
    %925 = arith.maximumf %923, %924 : vector<16x128xf32>
    %c0_416 = arith.constant 0 : index
    %c0_417 = arith.constant 0 : index
    %926 = vector.load %arg5[%c0_416, %c0_417] : memref<128x128xbf16, #tpu.memory_space<vmem>>, vector<128x128xbf16>
    %c0_418 = arith.constant 0 : index
    %c0_419 = arith.constant 0 : index
    %927 = vector.load %arg6[%c0_418, %c0_419] : memref<1x128xf32, #tpu.memory_space<vmem>>, vector<1x128xf32>
    %928 = arith.truncf %925 : vector<16x128xf32> to vector<16x128xbf16>
    %cst_420 = arith.constant dense<0.000000e+00> : vector<16x128xf32>
    %929 = tpu.matmul %928, %926, %cst_420 {dimension_numbers = #tpu.dot_dimension_numbers<[1], [0], [0], [1], [0, 0, 1, 1], [], []>} : vector<16x128xbf16>, vector<128x128xbf16>, vector<16x128xf32> -> vector<16x128xf32>
    %930 = vector.broadcast %927 : vector<1x128xf32> to vector<16x128xf32>
    %931 = arith.addf %929, %930 : vector<16x128xf32>
    %cst_421 = arith.constant 0.000000e+00 : f32
    %932 = vector.broadcast %cst_421 : f32 to vector<16x128xf32>
    %933 = arith.maximumf %931, %932 : vector<16x128xf32>
    %c0_422 = arith.constant 0 : index
    %c0_423 = arith.constant 0 : index
    %934 = vector.load %arg7[%c0_422, %c0_423] : memref<128x128xbf16, #tpu.memory_space<vmem>>, vector<128x128xbf16>
    %c0_424 = arith.constant 0 : index
    %c0_425 = arith.constant 0 : index
    %935 = vector.load %arg8[%c0_424, %c0_425] : memref<1x128xf32, #tpu.memory_space<vmem>>, vector<1x128xf32>
    %936 = arith.truncf %933 : vector<16x128xf32> to vector<16x128xbf16>
    %cst_426 = arith.constant dense<0.000000e+00> : vector<16x128xf32>
    %937 = tpu.matmul %936, %934, %cst_426 {dimension_numbers = #tpu.dot_dimension_numbers<[1], [0], [0], [1], [0, 0, 1, 1], [], []>} : vector<16x128xbf16>, vector<128x128xbf16>, vector<16x128xf32> -> vector<16x128xf32>
    %938 = vector.broadcast %935 : vector<1x128xf32> to vector<16x128xf32>
    %939 = arith.addf %937, %938 : vector<16x128xf32>
    %cst_427 = arith.constant dense<0xFF800000> : vector<16xf32>
    %940 = vector.multi_reduction <maximumf>, %939, %cst_427 [1] : vector<16x128xf32> to vector<16xf32>
    %941 = vector.shape_cast %940 : vector<16xf32> to vector<16x1xf32>
    %942 = vector.broadcast %941 : vector<16x1xf32> to vector<16x128xf32>
    %943 = arith.subf %939, %942 : vector<16x128xf32>
    %944 = math.exp %943 : vector<16x128xf32>
    %cst_428 = arith.constant dense<0.000000e+00> : vector<16xf32>
    %945 = vector.multi_reduction <add>, %944, %cst_428 [1] : vector<16x128xf32> to vector<16xf32>
    %946 = vector.shape_cast %945 : vector<16xf32> to vector<16x1xf32>
    %947 = math.log %946 : vector<16x1xf32>
    %948 = vector.broadcast %947 : vector<16x1xf32> to vector<16x128xf32>
    %949 = arith.subf %943, %948 : vector<16x128xf32>
    %c0_429 = arith.constant 0 : index
    %c0_430 = arith.constant 0 : index
    %950 = vector.load %arg9[%c0_429, %c0_430] : memref<16x128xf32, #tpu.memory_space<vmem>>, vector<16x128xf32>
    tpu.vector_store %arg9[%c0_429, %c0_430], %949 {strides = array<i32>} : memref<16x128xf32, #tpu.memory_space<vmem>>, vector<16x128xf32>,
    return
  }
  func.func @transform_0(%arg0: i32, %arg1: memref<128xi32, #tpu.memory_space<smem>>) -> (i32, i32) {
    %c0_i32 = arith.constant 0 : i32
    %c0_i32_0 = arith.constant 0 : i32
    %c0_i32_1 = arith.constant 0 : i32
    return %c0_i32, %c0_i32_0 : i32, i32
  }
  func.func @transform_1(%arg0: i32, %arg1: memref<128xi32, #tpu.memory_space<smem>>) -> (i32, i32) {
    %c0_i32 = arith.constant 0 : i32
    %c0_i32_0 = arith.constant 0 : i32
    %c0_i32_1 = arith.constant 0 : i32
    return %c0_i32, %c0_i32_0 : i32, i32
  }
  func.func @transform_2(%arg0: i32, %arg1: memref<128xi32, #tpu.memory_space<smem>>) -> (i32, i32) {
    %c0_i32 = arith.constant 0 : i32
    %c0_i32_0 = arith.constant 0 : i32
    %c0_i32_1 = arith.constant 0 : i32
    return %c0_i32, %c0_i32_0 : i32, i32
  }
  func.func @transform_3(%arg0: i32, %arg1: memref<128xi32, #tpu.memory_space<smem>>) -> (i32, i32) {
    %c0_i32 = arith.constant 0 : i32
    %c0_i32_0 = arith.constant 0 : i32
    %c0_i32_1 = arith.constant 0 : i32
    return %c0_i32, %c0_i32_0 : i32, i32
  }
  func.func @transform_4(%arg0: i32, %arg1: memref<128xi32, #tpu.memory_space<smem>>) -> (i32, i32) {
    %c0_i32 = arith.constant 0 : i32
    %c0_i32_0 = arith.constant 0 : i32
    %c0_i32_1 = arith.constant 0 : i32
    return %c0_i32, %c0_i32_0 : i32, i32
  }
  func.func @transform_5(%arg0: i32, %arg1: memref<128xi32, #tpu.memory_space<smem>>) -> (i32, i32) {
    %c0_i32 = arith.constant 0 : i32
    %c0_i32_0 = arith.constant 0 : i32
    %c0_i32_1 = arith.constant 0 : i32
    return %c0_i32, %c0_i32_0 : i32, i32
  }
  func.func @transform_6(%arg0: i32, %arg1: memref<128xi32, #tpu.memory_space<smem>>) -> (i32, i32) {
    %c0_i32 = arith.constant 0 : i32
    %c0_i32_0 = arith.constant 0 : i32
    %c0_i32_1 = arith.constant 0 : i32
    return %c0_i32, %c0_i32_0 : i32, i32
  }
  func.func @transform_7(%arg0: i32, %arg1: memref<128xi32, #tpu.memory_space<smem>>) -> (i32, i32) {
    %c0_i32 = arith.constant 0 : i32
    %c0_i32_0 = arith.constant 0 : i32
    return %arg0, %c0_i32 : i32, i32
  }
}

</mosaic_0001>

<bundles_post_ra>
// kernel: tpu_custom_call.1
= control target key start
LH: loop header
LB: loop body
LE: loop exit
PB: predicated region body
PF: predicated region fallthrough
CT: control target
= control target key end

     0   :  { %s1710_s27 = smov [#allocation4]   ;;  %s2452_s0 = inlined_call_operand.hbm [shape: s32[128], index: 0, kind: input, shape index: {}]   ;;  %s2453_s1 = inlined_call_operand.hbm [shape: f32[128,128], index: 1, kind: input, shape index: {}]   ;;  %s2454_s2 = inlined_call_operand.hbm [shape: bf16[128,128], index: 2, kind: input, shape index: {}]   ;;  %s2455_s3 = inlined_call_operand.vmem [shape: f32[1,128], index: 3, kind: input, shape index: {}]   ;;  %s2456_s4 = inlined_call_operand.hbm [shape: bf16[128,128], index: 4, kind: input, shape index: {}]   ;;  %s2457_s5 = inlined_call_operand.vmem [shape: f32[1,128], index: 5, kind: input, shape index: {}]   ;;  %s2458_s6 = inlined_call_operand.hbm [shape: bf16[128,128], index: 6, kind: input, shape index: {}]   ;;  %s2459_s7 = inlined_call_operand.vmem [shape: f32[1,128], index: 7, kind: input, shape index: {}]   ;;  %s2460_s8 = inlined_call_operand.hbm [shape: f32[16,128], index: 8, kind: output, shape index: {}]  }
   0x1   :  { %2463 = sst [smem:[#allocation81_spill]] %s2455_s3 }
   0x2   :  { %2464 = sst [smem:[#allocation82_spill]] %s2457_s5 }
   0x3   :  { %2465 = sst [smem:[#allocation83_spill]] %s2459_s7 }
   0x4   :  { %2466 = sst [smem:[#allocation84_spill]] %s2460_s8 }
   0x5   :  { %14 = dma.hbm_to_smem %s2452_s0, 16, %s1710_s27, [#allocation3] }
   0x6   :  { %1700 = dma.done.wait [#allocation3], 16 }
   0x7   :  { %1701 = vsyncadd [#allocation3], 4294967280 }
   0x8   :  { %16 = sfence }
   0x9   :  { %17 = vsyncpa [#allocation6], 0 }
   0xa   :  { %18 = vsyncpa [#allocation9], 0 }
   0xb   :  { %19 = vsyncpa [#allocation12], 0 }
   0xc   :  { %20 = vsyncpa [#allocation7], 0  ;;  %s1711_s30 = smov [#allocation8]  }
   0xd   :  { %s38_s9 = sshll.u32 %s1711_s30, 4  ;;  %s39_s9 = int_to_ptr.vmem [resolvable:$true] %s38_s9 }
   0xe   :  { %s1608_s10 = scalar_lea.vmem %s39_s9, 1024  ;;  %p1613_p1 = scmp.lt.s32.totalorder %s39_s9, %s39_s9 }
   0xf   :  { %p1609_p0 = scmp.ne.s32.totalorder %s39_s9, %s1608_s10  ;;  %p1614_p2 = scmp.lt.s32.totalorder %s1608_s10, %s1608_s10 }
  0x11   :  { %p1615_p3 = por %p1614_p2, %p1613_p1 }
  0x13   :  { %p1616_p4 = pnand %p1615_p3, %p1609_p0 }
  0x15   :  { %1619 = shalt.err (!%p1616_p4)
}
  0x16   :  { %s1712_s11 = smov 64   ;;  %s1713_s12 = smov 4  }
  0x17   :  { %44 = dma.hbm_to_vmem [thread:$0]  %s2454_s2, 1024, %s39_s9, [#allocation9], %s1712_s11, %s1712_s11, %s1713_s12  }
  0x18   :  { %s1714_s14 = smov [#allocation5]  }
  0x19   :  { %s26_s15 = sshll.u32 %s1714_s14, 4  ;;  %s27_s15 = int_to_ptr.vmem [resolvable:$true] %s26_s15 }
  0x1a   :  { %s1628_s16 = scalar_lea.vmem %s27_s15, 2048  ;;  %p1633_p6 = scmp.lt.s32.totalorder %s27_s15, %s27_s15 }
  0x1b   :  { %p1629_p5 = scmp.ne.s32.totalorder %s27_s15, %s1628_s16  ;;  %p1634_p7 = scmp.lt.s32.totalorder %s1628_s16, %s1628_s16 }
  0x1d   :  { %p1635_p8 = por %p1634_p7, %p1633_p6 }
  0x1f   :  { %p1636_p9 = pnand %p1635_p8, %p1629_p5 }
  0x21   :  { %1639 = shalt.err (!%p1636_p9)
}
  0x22   :  { %s2461_s17 = smov 128   ;;  %s2462_s18 = smov 8  }
  0x23   :  { %32 = dma.hbm_to_vmem [thread:$0]  %s2453_s1, 2048, %s27_s15, [#allocation6], %s2461_s17, %s2461_s17, %s2462_s18  }
  0x24   :  { %s1717_s2 = smov [#allocation10]   ;;  %s1718_s22 = smov [#allocation11]  }
  0x25   :  { %s52_s21 = sshll.u32 %s1717_s2, 4  ;;  %s66_s23 = sshll.u32 %s1718_s22, 4  ;;  %s53_s21 = int_to_ptr.vmem [resolvable:$true] %s52_s21  ;;  %s67_s23 = int_to_ptr.vmem [resolvable:$true] %s66_s23 }
  0x26   :  { %s1648_s24 = scalar_lea.vmem %s53_s21, 1024  ;;  %p1653_p11 = scmp.lt.s32.totalorder %s53_s21, %s53_s21 }
  0x27   :  { %p1649_p10 = scmp.ne.s32.totalorder %s53_s21, %s1648_s24  ;;  %p1654_p12 = scmp.lt.s32.totalorder %s1648_s24, %s1648_s24 }
  0x29   :  { %p1655_p13 = por %p1654_p12, %p1653_p11 }
  0x2b   :  { %p1656_p0 = pnand %p1655_p13, %p1649_p10 }
  0x2d   :  { %1659 = shalt.err (!%p1656_p0)
}
  0x2e   :  { %58 = dma.hbm_to_vmem [thread:$0]  %s2456_s4, 1024, %s53_s21, [#allocation9], %s1712_s11, %s1712_s11, %s1713_s12  }
  0x2f   :  { %s1668_s1 = scalar_lea.vmem %s67_s23, 1024  ;;  %p1673_p2 = scmp.lt.s32.totalorder %s67_s23, %s67_s23 }
  0x30   :  { %p1669_p1 = scmp.ne.s32.totalorder %s67_s23, %s1668_s1  ;;  %p1674_p3 = scmp.lt.s32.totalorder %s1668_s1, %s1668_s1 }
  0x32   :  { %p1675_p4 = por %p1674_p3, %p1673_p2 }
  0x34   :  { %p1676_p5 = pnand %p1675_p4, %p1669_p1 }
  0x36   :  { %1679 = shalt.err (!%p1676_p5)
}
  0x37   :  { %72 = dma.hbm_to_vmem [thread:$0]  %s2458_s6, 1024, %s67_s23, [#allocation12], %s1712_s11, %s1712_s11, %s1713_s12  }
  0x38   :  { %1702 = dma.done.wait [#allocation6], 2048  }
  0x39   :  { %1703 = vsyncadd [#allocation6], 4294965248 }
  0x3a   :  { %1704 = dma.done.wait [#allocation9], 2048  }
  0x3b   :  { %1705 = vsyncadd [#allocation9], 4294965248 }
  0x3c   :  { %1706 = dma.done.wait [#allocation12], 1024  }
  0x3d   :  { %1707 = vsyncadd [#allocation12], 4294966272  ;;  %v1719_v0 = vmov 0.0   ;;  %vm1720_vm0 = vmmov 0   ;;  %s1797_s4 = sld [smem:[#allocation4]]  ;;  %v1560_v1 = vld [vmem:[#allocation8 + $0x38] sm:$0xff]  }
  0x3e   :  { %1488 = vmatprep.subr.bf16.mxu0 %v1719_v0  ;;  %1504 = vmatprep.mubr.msk.bf16.mxu0 %vm1720_vm0, %v1719_v0  ;;  %s1802_s6 = sld [smem:[#allocation4 + $0x1]]  ;;  %v1561_v2 = vld [vmem:[#allocation8 + $0x30] sm:$0xff]   ;;  %v1562_v3 = vld [vmem:[#allocation8 + $0x28] sm:$0xff]   ;;  %v1563_v4 = vld [vmem:[#allocation8 + $0x20] sm:$0xff]   ;;  %vm429_vm1 = vcmask 1040384   ;;  %vm431_vm2 = vcmask 1041408  }
  0x3f   :  { %1508 = vmatprep.subr.bf16.mxu1 %v1719_v0  ;;  %1524 = vmatprep.mubr.msk.bf16.mxu1 %vm1720_vm0, %v1719_v0  ;;  %s1804_s29 = sld [smem:[#allocation4 + $0x2]]  ;;  %v1564_v5 = vld [vmem:[#allocation8 + $0x18] sm:$0xff]   ;;  %v1565_v6 = vld [vmem:[#allocation8 + $0x10] sm:$0xff]   ;;  %v1566_v7 = vld [vmem:[#allocation8 + $0x8] sm:$0xff]   ;;  %vm433_vm3 = vcmask 1042432   ;;  %vm435_vm4 = vcmask 1043456  }
  0x40   :  { %s1806_s30 = sld [smem:[#allocation4 + $0x3]]  ;;  %1489 = vmatpush3.bf16.msra.mxu0 %v1560_v1  ;;  %v1568_v8 = vld [vmem:[#allocation10 + $0x38] sm:$0xff]   ;;  %v1569_v9 = vld [vmem:[#allocation10 + $0x30] sm:$0xff]   ;;  %v1567_v10 = vld [vmem:[#allocation8] sm:$0xff]   ;;  %vm437_vm5 = vcmask 1044480   ;;  %vm439_vm6 = vcmask 1045504  }
  0x41   :  { %s1808_s9 = sld [smem:[#allocation4 + $0x4]]  ;;  %1490 = vmatprep.subr.bf16.mxu0 %v1719_v0  ;;  %1509 = vmatpush3.bf16.msra.mxu1 %v1568_v8  ;;  %v1570_v11 = vld [vmem:[#allocation10 + $0x28] sm:$0xff]   ;;  %v1571_v12 = vld [vmem:[#allocation10 + $0x20] sm:$0xff]   ;;  %v1572_v13 = vld [vmem:[#allocation10 + $0x18] sm:$0xff]   ;;  %vm441_vm7 = vcmask 1046528  }
  0x42   :  { %s1810_s10 = sld [smem:[#allocation4 + $0x5]]  ;;  %1510 = vmatprep.subr.bf16.mxu1 %v1719_v0 }
  0x43   :  { %s1814_s11 = sld [smem:[#allocation4 + $0x6]] }
  0x44   :  { %1491 = vmatpush3.bf16.msra.mxu0 %v1561_v2  ;;  %s1817_s12 = sld [smem:[#allocation4 + $0x7]] }
  0x45   :  { %1492 = vmatprep.subr.bf16.mxu0 %v1719_v0  ;;  %s1819_s0 = sld [smem:[#allocation4 + $0x8]]  ;;  %1511 = vmatpush3.bf16.msra.mxu1 %v1569_v9 }
  0x46   :  { %s1821_s13 = sld [smem:[#allocation4 + $0x9]]  ;;  %1512 = vmatprep.subr.bf16.mxu1 %v1719_v0 }
  0x47   :  { %s1823_s14 = sld [smem:[#allocation4 + $0xa]] }
  0x48   :  { %1493 = vmatpush3.bf16.msra.mxu0 %v1562_v3  ;;  %s1826_s15 = sld [smem:[#allocation4 + $0xb]] }
  0x49   :  { %1494 = vmatprep.subr.bf16.mxu0 %v1719_v0  ;;  %s1828_s16 = sld [smem:[#allocation4 + $0xc]]  ;;  %1513 = vmatpush3.bf16.msra.mxu1 %v1570_v11 }
  0x4a   :  { %s1830_s19 = sld [smem:[#allocation4 + $0xd]]  ;;  %1514 = vmatprep.subr.bf16.mxu1 %v1719_v0 }
  0x4b   :  { %s1832_s20 = sld [smem:[#allocation4 + $0xe]] }
  0x4c   :  { %1495 = vmatpush3.bf16.msra.mxu0 %v1563_v4  ;;  %s1835_s2 = sld [smem:[#allocation4 + $0xf]] }
  0x4d   :  { %1496 = vmatprep.subr.bf16.mxu0 %v1719_v0  ;;  %s1837_s21 = sld [smem:[#allocation4 + $0x10]]  ;;  %1515 = vmatpush3.bf16.msra.mxu1 %v1571_v12 }
  0x4e   :  { %s1839_s22 = sld [smem:[#allocation4 + $0x11]]  ;;  %1516 = vmatprep.subr.bf16.mxu1 %v1719_v0 }
  0x4f   :  { %s1841_s23 = sld [smem:[#allocation4 + $0x12]] }
  0x50   :  { %1497 = vmatpush3.bf16.msra.mxu0 %v1564_v5  ;;  %s1844_s24 = sld [smem:[#allocation4 + $0x13]] }
  0x51   :  { %1498 = vmatprep.subr.bf16.mxu0 %v1719_v0  ;;  %s1846_s25 = sld [smem:[#allocation4 + $0x14]]  ;;  %1517 = vmatpush3.bf16.msra.mxu1 %v1572_v13 }
  0x52   :  { %s1848_s26 = sld [smem:[#allocation4 + $0x15]]  ;;  %1518 = vmatprep.subr.bf16.mxu1 %v1719_v0 }
  0x53   :  { %s1851_s1 = sld [smem:[#allocation4 + $0x16]] }
  0x54   :  { %1499 = vmatpush3.bf16.msra.mxu0 %v1565_v6  ;;  %s1854_s27 = sld [smem:[#allocation4 + $0x17]] }
  0x55   :  { %1500 = vmatprep.subr.bf16.mxu0 %v1719_v0  ;;  %s1856_s28 = sld [smem:[#allocation4 + $0x18]] }
  0x56   :  { %s1858_s17 = sld [smem:[#allocation4 + $0x19]] }
  0x57   :  { %2467 = sst [smem:[#allocation19_spill]] %s1846_s25 }
  0x58   :  { %2468 = sst [smem:[#allocation20_spill]] %s1848_s26  ;;  %1501 = vmatpush3.bf16.msra.mxu0 %v1566_v7 }
  0x59   :  { %2469 = sst [smem:[#allocation21_spill]] %s1851_s1  ;;  %1502 = vmatprep.subr.bf16.mxu0 %v1719_v0 }
  0x5a   :  { %2470 = sst [smem:[#allocation22_spill]] %s1854_s27 }
  0x5b   :  { %2471 = sst [smem:[#allocation23_spill]] %s1856_s28 }
  0x5c   :  { %2472 = sst [smem:[#allocation24_spill]] %s1858_s17  ;;  %1503 = vmatpush3.bf16.msra.mxu0 %v1567_v10 }
  0x5d   :  { %s1861_s18 = sld [smem:[#allocation4 + $0x1a]]  ;;  %1528 = vmatprep.subr.bf16.mxu0 %v1719_v0 }
  0x5e   :  { %s1863_s8 = sld [smem:[#allocation4 + $0x1b]] }
  0x5f   :  { %s1866_s7 = sld [smem:[#allocation4 + $0x1c]] }
  0x60   :  { %s1868_s5 = sld [smem:[#allocation4 + $0x1d]] }
  0x61   :  { %s1871_s3 = sld [smem:[#allocation4 + $0x1e]] }
  0x62   :  { %s1873_s17 = sld [smem:[#allocation4 + $0x1f]] }
  0x63   :  { %2473 = sst [smem:[#allocation25_spill]] %s1861_s18 }
  0x64   :  { %2474 = sst [smem:[#allocation26_spill]] %s1863_s8 }
  0x65   :  { %2475 = sst [smem:[#allocation27_spill]] %s1866_s7 }
  0x66   :  { %2476 = sst [smem:[#allocation28_spill]] %s1868_s5 }
  0x67   :  { %2477 = sst [smem:[#allocation29_spill]] %s1871_s3 }
  0x68   :  { %2478 = sst [smem:[#allocation30_spill]] %s1873_s17 }
  0x69   :  { %s1875_s28 = sld [smem:[#allocation4 + $0x20]] }
  0x6a   :  { %s1877_s18 = sld [smem:[#allocation4 + $0x21]] }
  0x6b   :  { %s1880_s8 = sld [smem:[#allocation4 + $0x22]] }
  0x6c   :  { %s1882_s7 = sld [smem:[#allocation4 + $0x23]] }
  0x6d   :  { %s1884_s27 = sld [smem:[#allocation4 + $0x24]] }
  0x6e   :  { %s1886_s5 = sld [smem:[#allocation4 + $0x25]] }
  0x6f   :  { %2479 = sst [smem:[#allocation31_spill]] %s1875_s28 }
  0x70   :  { %2480 = sst [smem:[#allocation32_spill]] %s1877_s18 }
  0x71   :  { %2481 = sst [smem:[#allocation33_spill]] %s1880_s8 }
  0x72   :  { %2482 = sst [smem:[#allocation34_spill]] %s1882_s7 }
  0x73   :  { %2483 = sst [smem:[#allocation35_spill]] %s1884_s27 }
  0x74   :  { %2484 = sst [smem:[#allocation36_spill]] %s1886_s5 }
  0x75   :  { %s1889_s17 = sld [smem:[#allocation4 + $0x26]] }
  0x76   :  { %s1891_s28 = sld [smem:[#allocation4 + $0x27]] }
  0x77   :  { %s1893_s3 = sld [smem:[#allocation4 + $0x28]] }
  0x78   :  { %s1895_s18 = sld [smem:[#allocation4 + $0x29]] }
  0x79   :  { %s1897_s1 = sld [smem:[#allocation4 + $0x2a]] }
  0x7a   :  { %s1899_s8 = sld [smem:[#allocation4 + $0x2b]] }
  0x7b   :  { %2485 = sst [smem:[#allocation37_spill]] %s1889_s17 }
  0x7c   :  { %2486 = sst [smem:[#allocation38_spill]] %s1891_s28 }
  0x7d   :  { %2487 = sst [smem:[#allocation39_spill]] %s1893_s3 }
  0x7e   :  { %2488 = sst [smem:[#allocation40_spill]] %s1895_s18 }
  0x7f   :  { %2489 = sst [smem:[#allocation41_spill]] %s1897_s1 }
  0x80   :  { %2490 = sst [smem:[#allocation42_spill]] %s1899_s8 }
  0x81   :  { %s1901_s7 = sld [smem:[#allocation4 + $0x2c]] }
  0x82   :  { %s1903_s27 = sld [smem:[#allocation4 + $0x2d]] }
  0x83   :  { %s1905_s26 = sld [smem:[#allocation4 + $0x2e]] }
  0x84   :  { %s1907_s5 = sld [smem:[#allocation4 + $0x2f]] }
  0x85   :  { %s1909_s25 = sld [smem:[#allocation4 + $0x30]] }
  0x86   :  { %s1911_s17 = sld [smem:[#allocation4 + $0x31]] }
  0x87   :  { %2491 = sst [smem:[#allocation43_spill]] %s1901_s7 }
  0x88   :  { %2492 = sst [smem:[#allocation44_spill]] %s1903_s27 }
  0x89   :  { %2493 = sst [smem:[#allocation45_spill]] %s1905_s26 }
  0x8a   :  { %2494 = sst [smem:[#allocation46_spill]] %s1907_s5 }
  0x8b   :  { %2495 = sst [smem:[#allocation47_spill]] %s1909_s25 }
  0x8c   :  { %2496 = sst [smem:[#allocation48_spill]] %s1911_s17 }
  0x8d   :  { %s1913_s28 = sld [smem:[#allocation4 + $0x32]] }
  0x8e   :  { %s1915_s3 = sld [smem:[#allocation4 + $0x33]] }
  0x8f   :  { %s1917_s18 = sld [smem:[#allocation4 + $0x34]] }
  0x90   :  { %s1919_s1 = sld [smem:[#allocation4 + $0x35]] }
  0x91   :  { %s1921_s8 = sld [smem:[#allocation4 + $0x36]] }
  0x92   :  { %s1923_s7 = sld [smem:[#allocation4 + $0x37]] }
  0x93   :  { %2497 = sst [smem:[#allocation49_spill]] %s1913_s28 }
  0x94   :  { %2498 = sst [smem:[#allocation50_spill]] %s1915_s3 }
  0x95   :  { %2499 = sst [smem:[#allocation51_spill]] %s1917_s18 }
  0x96   :  { %2500 = sst [smem:[#allocation52_spill]] %s1919_s1 }
  0x97   :  { %2501 = sst [smem:[#allocation53_spill]] %s1921_s8 }
  0x98   :  { %2502 = sst [smem:[#allocation54_spill]] %s1923_s7 }
  0x99   :  { %s1925_s27 = sld [smem:[#allocation4 + $0x38]] }
  0x9a   :  { %s1927_s26 = sld [smem:[#allocation4 + $0x39]] }
  0x9b   :  { %s1929_s5 = sld [smem:[#allocation4 + $0x3a]] }
  0x9c   :  { %s1931_s25 = sld [smem:[#allocation4 + $0x3b]] }
  0x9d   :  { %s1933_s17 = sld [smem:[#allocation4 + $0x3c]] }
  0x9e   :  { %s1935_s28 = sld [smem:[#allocation4 + $0x3d]] }
  0x9f   :  { %2503 = sst [smem:[#allocation55_spill]] %s1925_s27 }
  0xa0   :  { %2504 = sst [smem:[#allocation56_spill]] %s1927_s26 }
  0xa1   :  { %2505 = sst [smem:[#allocation57_spill]] %s1929_s5 }
  0xa2   :  { %2506 = sst [smem:[#allocation58_spill]] %s1931_s25 }
  0xa3   :  { %2507 = sst [smem:[#allocation59_spill]] %s1933_s17 }
  0xa4   :  { %2508 = sst [smem:[#allocation60_spill]] %s1935_s28 }
  0xa5   :  { %s1937_s3 = sld [smem:[#allocation4 + $0x3e]] }
  0xa6   :  { %s1939_s18 = sld [smem:[#allocation4 + $0x3f]] }
  0xa7   :  { %s1941_s1 = sld [smem:[#allocation4 + $0x40]] }
  0xa8   :  { %s1943_s8 = sld [smem:[#allocation4 + $0x41]] }
  0xa9   :  { %s1945_s7 = sld [smem:[#allocation4 + $0x42]] }
  0xaa   :  { %s1947_s27 = sld [smem:[#allocation4 + $0x43]] }
  0xab   :  { %2509 = sst [smem:[#allocation61_spill]] %s1937_s3 }
  0xac   :  { %2510 = sst [smem:[#allocation62_spill]] %s1939_s18 }
  0xad   :  { %2511 = sst [smem:[#allocation63_spill]] %s1941_s1 }
  0xae   :  { %2512 = sst [smem:[#allocation64_spill]] %s1943_s8 }
  0xaf   :  { %2513 = sst [smem:[#allocation65_spill]] %s1945_s7 }
  0xb0   :  { %2514 = sst [smem:[#allocation66_spill]] %s1947_s27 }
  0xb1   :  { %s1949_s26 = sld [smem:[#allocation4 + $0x44]] }
  0xb2   :  { %s1951_s5 = sld [smem:[#allocation4 + $0x45]] }
  0xb3   :  { %s1953_s25 = sld [smem:[#allocation4 + $0x46]] }
  0xb4   :  { %s1955_s28 = sld [smem:[#allocation4 + $0x47]] }
  0xb5   :  { %s1957_s3 = sld [smem:[#allocation4 + $0x48]] }
  0xb6   :  { %s1959_s18 = sld [smem:[#allocation4 + $0x49]] }
  0xb7   :  { %2515 = sst [smem:[#allocation67_spill]] %s1949_s26 }
  0xb8   :  { %2516 = sst [smem:[#allocation68_spill]] %s1951_s5 }
  0xb9   :  { %2517 = sst [smem:[#allocation69_spill]] %s1953_s25 }
  0xba   :  { %2518 = sst [smem:[#allocation70_spill]] %s1955_s28 }
  0xbb   :  { %s1961_s17 = sld [smem:[#allocation4 + $0x4a]] }
  0xbc   :  { %s1963_s7 = sld [smem:[#allocation4 + $0x4b]] }
  0xbd   :  { %s1965_s27 = sld [smem:[#allocation4 + $0x4c]] }
  0xbe   :  { %s1967_s26 = sld [smem:[#allocation4 + $0x4d]] }
  0xbf   :  { %s1969_s5 = sld [smem:[#allocation4 + $0x4e]] }
  0xc0   :  { %s1971_s25 = sld [smem:[#allocation4 + $0x4f]] }
  0xc1   :  { %2519 = sst [smem:[#allocation71_spill]] %s1961_s17 }
  0xc2   :  { %2520 = sst [smem:[#allocation72_spill]] %s1963_s7 }
  0xc3   :  { %2521 = sst [smem:[#allocation73_spill]] %s1965_s27 }
  0xc4   :  { %2522 = sst [smem:[#allocation74_spill]] %s1967_s26  ;;  %s131_s26 = scalar_lea.vmem [#allocation5], %s1819_s0 }
  0xc5   :  { %2523 = sst [smem:[#allocation75_spill]] %s1969_s5  ;;  %v132_v14 = vld [vmem:[%s131_s26] sm:$0x1]  ;;  %s135_s5 = scalar_lea.vmem [#allocation5], %s1821_s13 }
  0xc6   :  { %2524 = sst [smem:[#allocation76_spill]] %s1971_s25  ;;  %v136_v15 = vld [vmem:[%s135_s5] sm:$0x1]  ;;  %s139_s25 = scalar_lea.vmem [#allocation5], %s1823_s14 }
  0xc7   :  { %s1973_s28 = sld [smem:[#allocation4 + $0x50]]  ;;  %v140_v16 = vld [vmem:[%s139_s25] sm:$0x1]  ;;  %s155_s0 = scalar_lea.vmem [#allocation5], %s1832_s20  ;;  %v161_v30 = vadd.f32 %v136_v15, %v132_v14 }
  0xc8   :  { %s1975_s8 = sld [smem:[#allocation4 + $0x51]]  ;;  %v156_v20 = vld [vmem:[%s155_s0] sm:$0x1]  ;;  %s159_s5 = scalar_lea.vmem [#allocation5], %s1835_s2 }
  0xc9   :  { %s1977_s1 = sld [smem:[#allocation4 + $0x52]]  ;;  %v160_v21 = vld [vmem:[%s159_s5] sm:$0x1]  ;;  %s107_s25 = scalar_lea.vmem [#allocation5], %s1808_s9 }
  0xca   :  { %s1979_s17 = sld [smem:[#allocation4 + $0x53]]  ;;  %v108_v26 = vld [vmem:[%s107_s25] sm:$0x1]  ;;  %s111_s20 = scalar_lea.vmem [#allocation5], %s1810_s10  ;;  %v164_v33 = vadd.f32 %v160_v21, %v156_v20 }
  0xcb   :  { %s1981_s7 = sld [smem:[#allocation4 + $0x54]]  ;;  %v112_v27 = vld [vmem:[%s111_s20] sm:$0x1]  ;;  %s115_s26 = scalar_lea.vmem [#allocation5], %s1814_s11 }
  0xcc   :  { %s1983_s27 = sld [smem:[#allocation4 + $0x55]]  ;;  %v116_v28 = vld [vmem:[%s115_s26] sm:$0x1]  ;;  %s171_s10 = scalar_lea.vmem [#allocation5], %s1837_s21  ;;  %v123_v38 = vadd.f32 %v112_v27, %v108_v26 }
  0xcd   :  { %2525 = sst [smem:[#allocation77_spill]] %s1973_s28  ;;  %s143_s28 = scalar_lea.vmem [#allocation5], %s1826_s15  ;;  %v172_v34 = vld [vmem:[%s171_s10] sm:$0x1] }
  0xce   :  { %v144_v17 = vld [vmem:[%s143_s28] sm:$0x1]  ;;  %s1994_s13 = sld [smem:[#allocation4 + $0x57]]  ;;  %s91_s15 = scalar_lea.vmem [#allocation5], %s1797_s4 }
  0xcf   :  { %2526 = sst [smem:[#allocation78_spill]] %s1977_s1  ;;  %s147_s1 = scalar_lea.vmem [#allocation5], %s1828_s16  ;;  %v92_v22 = vld [vmem:[%s91_s15] sm:$0x1]  ;;  %v162_v31 = vadd.f32 %v144_v17, %v140_v16 }
  0xd0   :  { %2527 = sst [smem:[#allocation79_spill]] %s1979_s17  ;;  %v148_v18 = vld [vmem:[%s147_s1] sm:$0x1]  ;;  %s151_s17 = scalar_lea.vmem [#allocation5], %s1830_s19 }
  0xd1   :  { %2528 = sst [smem:[#allocation80_spill]] %s1981_s7  ;;  %v152_v19 = vld [vmem:[%s151_s17] sm:$0x1]  ;;  %s95_s16 = scalar_lea.vmem [#allocation5], %s1802_s6  ;;  %v165_v46 = vadd.f32 %v162_v31, %v161_v30 }
  0xd2   :  { %s1991_s7 = sld [smem:[#allocation4 + $0x56]]  ;;  %v96_v23 = vld [vmem:[%s95_s16] sm:$0x1]  ;;  %s99_s19 = scalar_lea.vmem [#allocation5], %s1804_s29  ;;  %v163_v32 = vadd.f32 %v152_v19, %v148_v18 }
  0xd3   :  { %s1997_s14 = sld [smem:[#allocation4 + $0x58]]  ;;  %v100_v24 = vld [vmem:[%s99_s19] sm:$0x1]  ;;  %s103_s17 = scalar_lea.vmem [#allocation5], %s1806_s30  ;;  %v121_v36 = vadd.f32 %v96_v23, %v92_v22 }
  0xd4   :  { %v104_v25 = vld [vmem:[%s103_s17] sm:$0x1]  ;;  %s2005_s2 = sld [smem:[#allocation4 + $0x59]]  ;;  %s119_s4 = scalar_lea.vmem [#allocation5], %s1817_s12  ;;  %v166_v47 = vadd.f32 %v164_v33, %v163_v32 }
  0xd5   :  { %s2008_s1 = sld [smem:[#allocation4 + $0x5a]]  ;;  %v120_v29 = vld [vmem:[%s119_s4] sm:$0x1]  ;;  %s175_s28 = scalar_lea.vmem [#allocation5], %s1839_s22  ;;  %v122_v37 = vadd.f32 %v104_v25, %v100_v24 }
  0xd6   :  { %s2529_s6 = sld [smem:[#allocation19_spill]]  ;;  %v176_v35 = vld [vmem:[%s175_s28] sm:$0x1]  ;;  %v124_v39 = vadd.f32 %v120_v29, %v116_v28  ;;  %s179_s15 = scalar_lea.vmem [#allocation5], %s1841_s23  ;;  %v2043_v59 = vadd.f32 %v166_v47, %v165_v46 }
  0xd7   :  { %s2011_s29 = sld [smem:[#allocation4 + $0x5b]]  ;;  %v180_v40 = vld [vmem:[%s179_s15] sm:$0x1]  ;;  %s183_s19 = scalar_lea.vmem [#allocation5], %s1844_s24  ;;  %v125_v56 = vadd.f32 %v122_v37, %v121_v36  ;;  %v201_v58 = vadd.f32 %v176_v35, %v172_v34 }
  0xd8   :  { %s2013_s30 = sld [smem:[#allocation4 + $0x5c]]  ;;  %v184_v41 = vld [vmem:[%s183_s19] sm:$0x1]  ;;  %v126_v57 = vadd.f32 %v124_v39, %v123_v38  ;;  %v409_v25 = vrot.slane %v2043_v59, 7 }
  0xd9   :  { %s2530_s9 = sld [smem:[#allocation20_spill]]  ;;  %v202_v60 = vadd.f32 %v184_v41, %v180_v40 }
  0xda   :  { %s2531_s11 = sld [smem:[#allocation21_spill]]  ;;  %v2080_v19 = vadd.f32 %v126_v57, %v125_v56 }
  0xdb   :  { %s2532_s0 = sld [smem:[#allocation22_spill]]  ;;  %v2082_v20 = vadd.f32 %v202_v60, %v201_v58 }
  0xdc   :  { %s2017_s12 = sld [smem:[#allocation4 + $0x5d]]  ;;  %s187_s25 = scalar_lea.vmem [#allocation5], %s2529_s6 }
  0xdd   :  { %s2534_s5 = sld [smem:[#allocation23_spill]]  ;;  %v188_v42 = vld [vmem:[%s187_s25] sm:$0x1] }
  0xde   :  { %s2535_s16 = sld [smem:[#allocation24_spill]] }
  0xdf   :  { %s2536_s17 = sld [smem:[#allocation25_spill]]  ;;  %s191_s20 = scalar_lea.vmem [#allocation5], %s2530_s9 }
  0xe0   :  { %s2537_s21 = sld [smem:[#allocation26_spill]]  ;;  %v192_v43 = vld [vmem:[%s191_s20] sm:$0x1]  ;;  %s195_s26 = scalar_lea.vmem [#allocation5], %s2531_s11 }
  0xe1   :  { %s2538_s22 = sld [smem:[#allocation27_spill]]  ;;  %v196_v44 = vld [vmem:[%s195_s26] sm:$0x1]  ;;  %s199_s10 = scalar_lea.vmem [#allocation5], %s2532_s0  ;;  %v203_v61 = vadd.f32 %v192_v43, %v188_v42 }
  0xe2   :  { %2533 = sst [smem:[#allocation19_spill]] %s2017_s12  ;;  %v200_v45 = vld [vmem:[%s199_s10] sm:$0x1] }
  0xe3   :  { %s2539_s4 = sld [smem:[#allocation28_spill]]  ;;  %s211_s23 = scalar_lea.vmem [#allocation5], %s2534_s5  ;;  %v204_v62 = vadd.f32 %v200_v45, %v196_v44 }
  0xe4   :  { %s2025_s28 = sld [smem:[#allocation4 + $0x5e]]  ;;  %v212_v48 = vld [vmem:[%s211_s23] sm:$0x1]  ;;  %s215_s15 = scalar_lea.vmem [#allocation5], %s2535_s16 }
  0xe5   :  { %s2540_s12 = sld [smem:[#allocation29_spill]]  ;;  %v216_v49 = vld [vmem:[%s215_s15] sm:$0x1]  ;;  %s219_s6 = scalar_lea.vmem [#allocation5], %s2536_s17  ;;  %v2087_v22 = vadd.f32 %v204_v62, %v203_v61  ;;  %v2198_v61 = vsel %vm429_vm1, %v2080_v19, %v409_v25 }
  0xe6   :  { %s2541_s24 = sld [smem:[#allocation30_spill]]  ;;  %v220_v50 = vld [vmem:[%s219_s6] sm:$0x1]  ;;  %s223_s9 = scalar_lea.vmem [#allocation5], %s2537_s21  ;;  %v241_v63 = vadd.f32 %v216_v49, %v212_v48 }
  0xe7   :  { %v224_v51 = vld [vmem:[%s223_s9] sm:$0x1]  ;;  %s227_s19 = scalar_lea.vmem [#allocation5], %s2538_s22  ;;  %s2033_s0 = sld [smem:[#allocation4 + $0x5f]]  ;;  %v2188_v58 = vadd.f32 %v2087_v22, %v2082_v20 }
  0xe8   :  { %v228_v52 = vld [vmem:[%s227_s19] sm:$0x1]  ;;  %s2036_s20 = sld [smem:[#allocation4 + $0x60]]  ;;  %v242_v1 = vadd.f32 %v224_v51, %v220_v50 }
  0xe9   :  { %s231_s11 = scalar_lea.vmem [#allocation5], %s2539_s4  ;;  %s2544_s5 = sld [smem:[#allocation31_spill]] }
  0xea   :  { %v232_v53 = vld [vmem:[%s231_s11] sm:$0x1]  ;;  %s2039_s10 = sld [smem:[#allocation4 + $0x61]]  ;;  %v2089_v23 = vadd.f32 %v242_v1, %v241_v63 }
  0xeb   :  { %s235_s25 = scalar_lea.vmem [#allocation5], %s2540_s12  ;;  %s2546_s16 = sld [smem:[#allocation32_spill]]  ;;  %v243_v2 = vadd.f32 %v232_v53, %v228_v52 }
  0xec   :  { %v236_v54 = vld [vmem:[%s235_s25] sm:$0x1]  ;;  %s239_s26 = scalar_lea.vmem [#allocation5], %s2541_s24  ;;  %s2547_s17 = sld [smem:[#allocation33_spill]] }
  0xed   :  { %2542 = sst [smem:[#allocation20_spill]] %s2033_s0  ;;  %v240_v55 = vld [vmem:[%s239_s26] sm:$0x1] }
  0xee   :  { %2543 = sst [smem:[#allocation21_spill]] %s2036_s20  ;;  %v244_v3 = vadd.f32 %v240_v55, %v236_v54 }
  0xef   :  { %s2041_s21 = sld [smem:[#allocation4 + $0x62]]  ;;  %s251_s9 = scalar_lea.vmem [#allocation5], %s2544_s5 }
  0xf0   :  { %2545 = sst [smem:[#allocation22_spill]] %s2039_s10  ;;  %v2050_v4 = vld [vmem:[%s251_s9] sm:$0x1]  ;;  %v2091_v24 = vadd.f32 %v244_v3, %v243_v2 }
  0xf1   :  { %s2549_s22 = sld [smem:[#allocation34_spill]]  ;;  %s255_s11 = scalar_lea.vmem [#allocation5], %s2546_s16 }
  0xf2   :  { %s2550_s12 = sld [smem:[#allocation35_spill]]  ;;  %v2053_v5 = vld [vmem:[%s255_s11] sm:$0x1]  ;;  %s259_s26 = scalar_lea.vmem [#allocation5], %s2547_s17  ;;  %v2192_v60 = vadd.f32 %v2091_v24, %v2089_v23 }
  0xf3   :  { %s2045_s4 = sld [smem:[#allocation4 + $0x63]]  ;;  %v2056_v6 = vld [vmem:[%s259_s26] sm:$0x1]  ;;  %v2136_v40 = vadd.f32 %v2053_v5, %v2050_v4 }
  0xf4   :  { %s2552_s23 = sld [smem:[#allocation36_spill]] }
  0xf5   :  { %2548 = sst [smem:[#allocation23_spill]] %s2041_s21 }
  0xf6   :  { %s2553_s24 = sld [smem:[#allocation37_spill]] }
  0xf7   :  { %s2554_s15 = sld [smem:[#allocation38_spill]]  ;;  %s263_s21 = scalar_lea.vmem [#allocation5], %s2549_s22 }
  0xf8   :  { %s2047_s6 = sld [smem:[#allocation4 + $0x64]]  ;;  %v2059_v7 = vld [vmem:[%s263_s21] sm:$0x1]  ;;  %s267_s20 = scalar_lea.vmem [#allocation5], %s2550_s12 }
  0xf9   :  { %2551 = sst [smem:[#allocation24_spill]] %s2045_s4  ;;  %v2062_v8 = vld [vmem:[%s267_s20] sm:$0x1]  ;;  %v2140_v41 = vadd.f32 %v2059_v7, %v2056_v6 }
  0xfa   :  { %s2556_s19 = sld [smem:[#allocation39_spill]]  ;;  %s271_s5 = scalar_lea.vmem [#allocation5], %s2552_s23 }
  0xfb   :  { %s2557_s25 = sld [smem:[#allocation40_spill]]  ;;  %v2065_v9 = vld [vmem:[%s271_s5] sm:$0x1]  ;;  %v2265_v20 = vadd.f32 %v2140_v41, %v2136_v40 }
  0xfc   :  { %s2558_s4 = sld [smem:[#allocation41_spill]]  ;;  %s275_s16 = scalar_lea.vmem [#allocation5], %s2553_s24  ;;  %v2144_v42 = vadd.f32 %v2065_v9, %v2062_v8 }
  0xfd   :  { %s2559_s10 = sld [smem:[#allocation42_spill]]  ;;  %v276_v10 = vld [vmem:[%s275_s16] sm:$0x1]  ;;  %s279_s0 = scalar_lea.vmem [#allocation5], %s2554_s15 }
  0xfe   :  { %2555 = sst [smem:[#allocation25_spill]] %s2047_s6  ;;  %v280_v11 = vld [vmem:[%s279_s0] sm:$0x1] }
  0xff   :  { %s2560_s6 = sld [smem:[#allocation43_spill]]  ;;  %v2146_v43 = vadd.f32 %v280_v11, %v276_v10 }
 0x100   :  { %s2561_s9 = sld [smem:[#allocation44_spill]]  ;;  %s291_s26 = scalar_lea.vmem [#allocation5], %s2556_s19 }
 0x101   :  { %s2562_s11 = sld [smem:[#allocation45_spill]]  ;;  %v292_v12 = vld [vmem:[%s291_s26] sm:$0x1]  ;;  %s295_s22 = scalar_lea.vmem [#allocation5], %s2557_s25 }
 0x102   :  { %s2069_s17 = sld [smem:[#allocation4 + $0x65]]  ;;  %v296_v13 = vld [vmem:[%s295_s22] sm:$0x1]  ;;  %s299_s12 = scalar_lea.vmem [#allocation5], %s2558_s4 }
 0x103   :  { %s2563_s21 = sld [smem:[#allocation46_spill]]  ;;  %v300_v14 = vld [vmem:[%s299_s12] sm:$0x1]  ;;  %s303_s20 = scalar_lea.vmem [#allocation5], %s2559_s10  ;;  %v2151_v45 = vadd.f32 %v296_v13, %v292_v12 }
 0x104   :  { %v304_v15 = vld [vmem:[%s303_s20] sm:$0x1]  ;;  %s2564_s15 = sld [smem:[#allocation71_spill]]  ;;  %s491_s26 = scalar_lea.vmem [#allocation5], %s1959_s18 }
 0x105   :  { %s307_s23 = scalar_lea.vmem [#allocation5], %s2560_s6  ;;  %s2078_s0 = sld [smem:[#allocation4 + $0x66]]  ;;  %v2098_v27 = vld [vmem:[%s491_s26] sm:$0x1]  ;;  %v2153_v46 = vadd.f32 %v304_v15, %v300_v14 }
 0x106   :  { %v308_v16 = vld [vmem:[%s307_s23] sm:$0x1]  ;;  %s311_s5 = scalar_lea.vmem [#allocation5], %s2561_s9  ;;  %s2565_s19 = sld [smem:[#allocation72_spill]] }
 0x107   :  { %v312_v17 = vld [vmem:[%s311_s5] sm:$0x1]  ;;  %s315_s24 = scalar_lea.vmem [#allocation5], %s2562_s11  ;;  %s2566_s4 = sld [smem:[#allocation73_spill]]  ;;  %v2273_v22 = vadd.f32 %v2153_v46, %v2151_v45 }
 0x108   :  { %v316_v18 = vld [vmem:[%s315_s24] sm:$0x1]  ;;  %s2567_s10 = sld [smem:[#allocation74_spill]]  ;;  %s487_s11 = scalar_lea.vmem [#allocation5], %s1957_s3  ;;  %v2155_v47 = vadd.f32 %v312_v17, %v308_v16 }
 0x109   :  { %s319_s25 = scalar_lea.vmem [#allocation5], %s2563_s21  ;;  %s2085_s6 = sld [smem:[#allocation4 + $0x67]]  ;;  %v2095_v26 = vld [vmem:[%s487_s11] sm:$0x1] }
 0x10a   :  { %v320_v21 = vld [vmem:[%s319_s25] sm:$0x1]  ;;  %s2568_s9 = sld [smem:[#allocation75_spill]]  ;;  %s495_s21 = scalar_lea.vmem [#allocation5], %s2564_s15  ;;  %v517_v6 = vadd.f32 %v2098_v27, %v2095_v26 }
 0x10b   :  { %s2569_s16 = sld [smem:[#allocation76_spill]]  ;;  %v2101_v28 = vld [vmem:[%s495_s21] sm:$0x1]  ;;  %v2157_v48 = vadd.f32 %v320_v21, %v316_v18  ;;  %v2269_v21 = vadd.f32 %v2146_v43, %v2144_v42 }
 0x10c   :  { %s2570_s22 = sld [smem:[#allocation77_spill]]  ;;  %s499_s12 = scalar_lea.vmem [#allocation5], %s2565_s19 }
 0x10d   :  { %s2571_s20 = sld [smem:[#allocation78_spill]]  ;;  %v2104_v29 = vld [vmem:[%s499_s12] sm:$0x1]  ;;  %s503_s23 = scalar_lea.vmem [#allocation5], %s2566_s4  ;;  %v2277_v23 = vadd.f32 %v2157_v48, %v2155_v47 }
 0x10e   :  { %s2572_s5 = sld [smem:[#allocation79_spill]]  ;;  %v2107_v30 = vld [vmem:[%s503_s23] sm:$0x1]  ;;  %s507_s24 = scalar_lea.vmem [#allocation5], %s2567_s10  ;;  %v518_v7 = vadd.f32 %v2104_v29, %v2101_v28 }
 0x10f   :  { %s2573_s3 = sld [smem:[#allocation80_spill]]  ;;  %v2110_v31 = vld [vmem:[%s507_s24] sm:$0x1]  ;;  %s531_s4 = scalar_lea.vmem [#allocation5], %s1975_s8 }
 0x110   :  { %s511_s18 = scalar_lea.vmem [#allocation5], %s2568_s9  ;;  %s2118_s25 = sld [smem:[#allocation4 + $0x68]]  ;;  %v2124_v35 = vld [vmem:[%s531_s4] sm:$0x1]  ;;  %v519_v8 = vadd.f32 %v2110_v31, %v2107_v30  ;;  %v521_v40 = vadd.f32 %v518_v7, %v517_v6 }
 0x111   :  { %v2113_v32 = vld [vmem:[%s511_s18] sm:$0x1]  ;;  %s515_s15 = scalar_lea.vmem [#allocation5], %s2569_s16  ;;  %s2574_s26 = sld [smem:[#allocation47_spill]] }
 0x112   :  { %v2116_v33 = vld [vmem:[%s515_s15] sm:$0x1]  ;;  %s527_s19 = scalar_lea.vmem [#allocation5], %s2570_s22  ;;  %s547_s16 = scalar_lea.vmem [#allocation5], %s1983_s27 }
 0x113   :  { %v2121_v34 = vld [vmem:[%s527_s19] sm:$0x1]  ;;  %s535_s10 = scalar_lea.vmem [#allocation5], %s2571_s20  ;;  %s2575_s21 = sld [smem:[#allocation48_spill]]  ;;  %v520_v9 = vadd.f32 %v2116_v33, %v2113_v32 }
 0x114   :  { %v2127_v36 = vld [vmem:[%s535_s10] sm:$0x1]  ;;  %s539_s9 = scalar_lea.vmem [#allocation5], %s2572_s5  ;;  %s2132_s12 = sld [smem:[#allocation4 + $0x69]]  ;;  %v2236_v10 = vadd.f32 %v2124_v35, %v2121_v34 }
 0x115   :  { %v540_v37 = vld [vmem:[%s539_s9] sm:$0x1]  ;;  %s543_s11 = scalar_lea.vmem [#allocation5], %s2573_s3  ;;  %s2576_s22 = sld [smem:[#allocation49_spill]]  ;;  %v522_v41 = vadd.f32 %v520_v9, %v519_v8 }
 0x116   :  { %v544_v38 = vld [vmem:[%s543_s11] sm:$0x1]  ;;  %s2577_s8 = sld [smem:[#allocation50_spill]]  ;;  %s551_s20 = scalar_lea.vmem [#allocation5], %s1991_s7  ;;  %v2239_v11 = vadd.f32 %v540_v37, %v2127_v36 }
 0x117   :  { %v548_v39 = vld [vmem:[%s547_s16] sm:$0x1]  ;;  %s2578_s27 = sld [smem:[#allocation63_spill]]  ;;  %s331_s18 = scalar_lea.vmem [#allocation5], %s2574_s26 }
 0x118   :  { %v552_v44 = vld [vmem:[%s551_s20] sm:$0x1]  ;;  %s2579_s23 = sld [smem:[#allocation64_spill]]  ;;  %v2241_v12 = vadd.f32 %v548_v39, %v544_v38 }
 0x119   :  { %s2149_s5 = sld [smem:[#allocation4 + $0x6a]]  ;;  %v2160_v49 = vld [vmem:[%s331_s18] sm:$0x1]  ;;  %s335_s15 = scalar_lea.vmem [#allocation5], %s2575_s21 }
 0x11a   :  { %s2580_s24 = sld [smem:[#allocation65_spill]]  ;;  %v2163_v50 = vld [vmem:[%s335_s15] sm:$0x1] }
 0x11b   :  { %s2581_s3 = sld [smem:[#allocation66_spill]]  ;;  %s339_s7 = scalar_lea.vmem [#allocation5], %s2576_s22  ;;  %v361_v31 = vadd.f32 %v2163_v50, %v2160_v49 }
 0x11c   :  { %v2166_v51 = vld [vmem:[%s339_s7] sm:$0x1]  ;;  %s343_s19 = scalar_lea.vmem [#allocation5], %s2577_s8  ;;  %s2582_s4 = sld [smem:[#allocation67_spill]] }
 0x11d   :  { %v2169_v52 = vld [vmem:[%s343_s19] sm:$0x1]  ;;  %s447_s10 = scalar_lea.vmem [#allocation5], %s2578_s27  ;;  %s2583_s9 = sld [smem:[#allocation68_spill]] }
 0x11e   :  { %v2172_v53 = vld [vmem:[%s447_s10] sm:$0x1]  ;;  %s451_s11 = scalar_lea.vmem [#allocation5], %s2579_s23  ;;  %s2584_s16 = sld [smem:[#allocation69_spill]]  ;;  %v362_v32 = vadd.f32 %v2169_v52, %v2166_v51  ;;  %v561_v51 = vadd.f32 %v2239_v11, %v2236_v10  ;;  %v2351_v11 = vadd.f32 %v522_v41, %v521_v40 }
 0x11f   :  { %v2175_v54 = vld [vmem:[%s451_s11] sm:$0x1]  ;;  %s2585_s21 = sld [smem:[#allocation51_spill]]  ;;  %s555_s8 = scalar_lea.vmem [#allocation5], %s1994_s13 }
 0x120   :  { %s455_s26 = scalar_lea.vmem [#allocation5], %s2580_s24  ;;  %s2586_s22 = sld [smem:[#allocation52_spill]]  ;;  %v556_v57 = vld [vmem:[%s555_s8] sm:$0x1]  ;;  %v477_v35 = vadd.f32 %v2175_v54, %v2172_v53 }
 0x121   :  { %v2178_v55 = vld [vmem:[%s455_s26] sm:$0x1]  ;;  %s459_s20 = scalar_lea.vmem [#allocation5], %s2581_s3  ;;  %s2587_s18 = sld [smem:[#allocation53_spill]]  ;;  %v2243_v13 = vadd.f32 %v556_v57, %v552_v44 }
 0x122   :  { %v2181_v56 = vld [vmem:[%s459_s20] sm:$0x1]  ;;  %s2184_s15 = sld [smem:[#allocation4 + $0x6b]]  ;;  %s463_s23 = scalar_lea.vmem [#allocation5], %s2582_s4 }
 0x123   :  { %s2588_s27 = sld [smem:[#allocation54_spill]]  ;;  %v2201_v62 = vld [vmem:[%s463_s23] sm:$0x1]  ;;  %s467_s24 = scalar_lea.vmem [#allocation5], %s2583_s9  ;;  %v478_v36 = vadd.f32 %v2181_v56, %v2178_v55  ;;  %v562_v52 = vadd.f32 %v2243_v13, %v2241_v12 }
 0x124   :  { %s2589_s13 = sld [smem:[#allocation70_spill]]  ;;  %v2204_v63 = vld [vmem:[%s467_s24] sm:$0x1]  ;;  %s471_s3 = scalar_lea.vmem [#allocation5], %s2584_s16 }
 0x125   :  { %v2207_v1 = vld [vmem:[%s471_s3] sm:$0x1]  ;;  %s2209_s7 = sld [smem:[#allocation4 + $0x6c]]  ;;  %s347_s19 = scalar_lea.vmem [#allocation5], %s2585_s21  ;;  %v479_v38 = vadd.f32 %v2204_v63, %v2201_v62  ;;  %v481_v9 = vadd.f32 %v478_v36, %v477_v35  ;;  %v765_v36 = vrot.slane %v2351_v11, 7 }
 0x126   :  { %v2212_v2 = vld [vmem:[%s347_s19] sm:$0x1]  ;;  %s351_s10 = scalar_lea.vmem [#allocation5], %s2586_s22  ;;  %s2590_s16 = sld [smem:[#allocation19_spill]] }
 0x127   :  { %v2215_v59 = vld [vmem:[%s351_s10] sm:$0x1]  ;;  %s355_s11 = scalar_lea.vmem [#allocation5], %s2587_s18  ;;  %s2232_s26 = sld [smem:[#allocation4 + $0x6d]] }
 0x128   :  { %v2218_v3 = vld [vmem:[%s355_s11] sm:$0x1]  ;;  %s567_s21 = scalar_lea.vmem [#allocation5], %s1997_s14  ;;  %s2591_s20 = sld [smem:[#allocation55_spill]]  ;;  %v363_v49 = vadd.f32 %v2215_v59, %v2212_v2 }
 0x129   :  { %s359_s4 = scalar_lea.vmem [#allocation5], %s2588_s27  ;;  %v2246_v14 = vld [vmem:[%s567_s21] sm:$0x1]  ;;  %s571_s22 = scalar_lea.vmem [#allocation5], %s2005_s2 }
 0x12a   :  { %v2221_v4 = vld [vmem:[%s359_s4] sm:$0x1]  ;;  %s475_s9 = scalar_lea.vmem [#allocation5], %s2589_s13  ;;  %s2592_s8 = sld [smem:[#allocation56_spill]] }
 0x12b   :  { %v476_v5 = vld [vmem:[%s475_s9] sm:$0x1]  ;;  %s575_s18 = scalar_lea.vmem [#allocation5], %s2008_s1  ;;  %s2593_s27 = sld [smem:[#allocation57_spill]]  ;;  %v364_v50 = vadd.f32 %v2221_v4, %v2218_v3  ;;  %v365_v3 = vadd.f32 %v362_v32, %v361_v31 }
 0x12c   :  { %v2249_v15 = vld [vmem:[%s571_s22] sm:$0x1]  ;;  %s579_s13 = scalar_lea.vmem [#allocation5], %s2011_s29  ;;  %s2594_s23 = sld [smem:[#allocation58_spill]]  ;;  %v480_v39 = vadd.f32 %v476_v5, %v2207_v1 }
 0x12d   :  { %v2252_v16 = vld [vmem:[%s575_s18] sm:$0x1]  ;;  %s583_s24 = scalar_lea.vmem [#allocation5], %s2013_s30  ;;  %s2595_s3 = sld [smem:[#allocation59_spill]]  ;;  %v597_v54 = vadd.f32 %v2249_v15, %v2246_v14 }
 0x12e   :  { %v2255_v17 = vld [vmem:[%s579_s13] sm:$0x1]  ;;  %s587_s14 = scalar_lea.vmem [#allocation5], %s2590_s16  ;;  %s2596_s19 = sld [smem:[#allocation60_spill]]  ;;  %v482_v10 = vadd.f32 %v480_v39, %v479_v38  ;;  %v412_v38 = vrot.slane %v2188_v58, 6 }
 0x12f   :  { %v2258_v18 = vld [vmem:[%s583_s24] sm:$0x1]  ;;  %s2261_s10 = sld [smem:[#allocation4 + $0x6e]]  ;;  %s371_s2 = scalar_lea.vmem [#allocation5], %s2591_s20  ;;  %v598_v55 = vadd.f32 %v2255_v17, %v2252_v16 }
 0x130   :  { %v588_v19 = vld [vmem:[%s587_s14] sm:$0x1]  ;;  %s2597_s1 = sld [smem:[#allocation61_spill]]  ;;  %s375_s29 = scalar_lea.vmem [#allocation5], %s2592_s8 }
 0x131   :  { %v2280_v24 = vld [vmem:[%s371_s2] sm:$0x1]  ;;  %s2598_s30 = sld [smem:[#allocation62_spill]]  ;;  %s379_s11 = scalar_lea.vmem [#allocation5], %s2593_s27  ;;  %v599_v56 = vadd.f32 %v588_v19, %v2258_v18  ;;  %v366_v18 = vadd.f32 %v364_v50, %v363_v49  ;;  %v2359_v19 = vadd.f32 %v562_v52, %v561_v51 }
 0x132   :  { %v2283_v25 = vld [vmem:[%s375_s29] sm:$0x1]  ;;  %s383_s4 = scalar_lea.vmem [#allocation5], %s2594_s23  ;;  %s2599_s9 = sld [smem:[#allocation20_spill]] }
 0x133   :  { %v2286_v26 = vld [vmem:[%s379_s11] sm:$0x1]  ;;  %s387_s16 = scalar_lea.vmem [#allocation5], %s2595_s3  ;;  %s591_s22 = scalar_lea.vmem [#allocation5], %s2025_s28  ;;  %v401_v4 = vadd.f32 %v2283_v25, %v2280_v24  ;;  %v601_v24 = vadd.f32 %v598_v55, %v597_v54  ;;  %v2386_v58 = vadd.f32 %v366_v18, %v365_v3 }
 0x134   :  { %v2289_v27 = vld [vmem:[%s383_s4] sm:$0x1]  ;;  %s391_s21 = scalar_lea.vmem [#allocation5], %s2596_s19  ;;  %s2294_s20 = sld [smem:[#allocation4 + $0x6f]] }
 0x135   :  { %v388_v28 = vld [vmem:[%s387_s16] sm:$0x1]  ;;  %s2600_s8 = sld [smem:[#allocation21_spill]]  ;;  %s627_s11 = scalar_lea.vmem [#allocation5], %s2069_s17  ;;  %v402_v5 = vadd.f32 %v2289_v27, %v2286_v26 }
 0x136   :  { %v392_v29 = vld [vmem:[%s391_s21] sm:$0x1]  ;;  %s2601_s18 = sld [smem:[#allocation22_spill]]  ;;  %s395_s27 = scalar_lea.vmem [#allocation5], %s2597_s1 }
 0x137   :  { %v592_v30 = vld [vmem:[%s591_s22] sm:$0x1]  ;;  %s2602_s13 = sld [smem:[#allocation23_spill]]  ;;  %s399_s23 = scalar_lea.vmem [#allocation5], %s2598_s30  ;;  %v403_v6 = vadd.f32 %v392_v29, %v388_v28  ;;  %v405_v32 = vadd.f32 %v402_v5, %v401_v4 }
 0x138   :  { %v396_v33 = vld [vmem:[%s395_s27] sm:$0x1]  ;;  %s2603_s24 = sld [smem:[#allocation24_spill]]  ;;  %s595_s3 = scalar_lea.vmem [#allocation5], %s2599_s9 }
 0x139   :  { %v400_v34 = vld [vmem:[%s399_s23] sm:$0x1]  ;;  %s2604_s28 = sld [smem:[#allocation25_spill]]  ;;  %s631_s4 = scalar_lea.vmem [#allocation5], %s2078_s0 }
 0x13a   :  { %v596_v37 = vld [vmem:[%s595_s3] sm:$0x1]  ;;  %s2307_s14 = sld [smem:[#allocation4 + $0x70]]  ;;  %s635_s17 = scalar_lea.vmem [#allocation5], %s2085_s6  ;;  %v404_v8 = vadd.f32 %v400_v34, %v396_v33  ;;  %v483_v34 = vadd.f32 %v482_v10, %v481_v9 }
 0x13b   :  { %s607_s19 = scalar_lea.vmem [#allocation5], %s2600_s8  ;;  %v628_v47 = vld [vmem:[%s627_s11] sm:$0x1]  ;;  %s2319_s9 = sld [smem:[#allocation4 + $0x71]]  ;;  %v600_v57 = vadd.f32 %v596_v37, %v592_v30  ;;  %v2373_v37 = vadd.f32 %v2269_v21, %v2265_v20 }
 0x13c   :  { %v608_v42 = vld [vmem:[%s607_s19] sm:$0x1]  ;;  %s611_s2 = scalar_lea.vmem [#allocation5], %s2601_s18  ;;  %s2330_s0 = sld [smem:[#allocation4 + $0x72]]  ;;  %v406_v33 = vadd.f32 %v404_v8, %v403_v6  ;;  %v785_v51 = vsel %vm429_vm1, %v483_v34, %v765_v36 }
 0x13d   :  { %v612_v43 = vld [vmem:[%s611_s2] sm:$0x1]  ;;  %s615_s1 = scalar_lea.vmem [#allocation5], %s2602_s13  ;;  %s647_s16 = scalar_lea.vmem [#allocation5], %s2118_s25  ;;  %v602_v25 = vadd.f32 %v600_v57, %v599_v56  ;;  %v418_v52 = vrot.slane %v2373_v37, 4 }
 0x13e   :  { %v616_v44 = vld [vmem:[%s615_s1] sm:$0x1]  ;;  %s619_s29 = scalar_lea.vmem [#allocation5], %s2603_s24  ;;  %s651_s21 = scalar_lea.vmem [#allocation5], %s2132_s12  ;;  %v637_v13 = vadd.f32 %v612_v43, %v608_v42  ;;  %v2381_v42 = vadd.f32 %v2277_v23, %v2273_v22  ;;  %v768_v22 = vrot.slane %v2359_v19, 6  ;;  %v407_v23 = vadd.f32 %v406_v33, %v405_v32 }
 0x13f   :  { %v620_v45 = vld [vmem:[%s619_s29] sm:$0x1]  ;;  %s623_s30 = scalar_lea.vmem [#allocation5], %s2604_s28  ;;  %s655_s6 = scalar_lea.vmem [#allocation5], %s2149_s5  ;;  %v603_v43 = vadd.f32 %v602_v25, %v601_v24 }
 0x140   :  { %v624_v46 = vld [vmem:[%s623_s30] sm:$0x1]  ;;  %s659_s22 = scalar_lea.vmem [#allocation5], %s2184_s15  ;;  %s663_s8 = scalar_lea.vmem [#allocation5], %s2209_s7  ;;  %v638_v14 = vadd.f32 %v620_v45, %v616_v44  ;;  %v427_v3 = vrot.slane %v407_v23, 1 }
 0x141   :  { %v632_v48 = vld [vmem:[%s631_s4] sm:$0x1]  ;;  %s2342_s18 = sld [smem:[#allocation4 + $0x73]]  ;;  %s667_s25 = scalar_lea.vmem [#allocation5], %s2232_s26  ;;  %v639_v15 = vadd.f32 %v628_v47, %v624_v46 }
 0x142   :  { %v636_v53 = vld [vmem:[%s635_s17] sm:$0x1]  ;;  %s2349_s12 = sld [smem:[#allocation4 + $0x74]]  ;;  %s671_s5 = scalar_lea.vmem [#allocation5], %s2261_s10  ;;  %v641_v39 = vadd.f32 %v638_v14, %v637_v13 }
 0x143   :  { %v648_v62 = vld [vmem:[%s647_s16] sm:$0x1]  ;;  %s2354_s15 = sld [smem:[#allocation4 + $0x75]]  ;;  %v640_v16 = vadd.f32 %v636_v53, %v632_v48  ;;  %s675_s7 = scalar_lea.vmem [#allocation5], %s2294_s20  ;;  %v415_v48 = vrot.slane %v2192_v60, 5  ;;  %v432_v53 = vsel %vm431_vm2, %v2198_v61, %v412_v38  ;;  %v421_v60 = vrot.slane %v2381_v42, 3 }
 0x144   :  { %v652_v63 = vld [vmem:[%s651_s21] sm:$0x1]  ;;  %s2357_s26 = sld [smem:[#allocation4 + $0x76]]  ;;  %s687_s10 = scalar_lea.vmem [#allocation5], %s2307_s14  ;;  %v1573_v38 = vld [vmem:[#allocation10 + $0x10] sm:$0xff]  }
 0x145   :  { %v656_v1 = vld [vmem:[%s655_s6] sm:$0x1]  ;;  %s2362_s27 = sld [smem:[#allocation4 + $0x77]]  ;;  %v677_v27 = vadd.f32 %v652_v63, %v648_v62  ;;  %s691_s13 = scalar_lea.vmem [#allocation5], %s2319_s9  ;;  %v642_v40 = vadd.f32 %v640_v16, %v639_v15  ;;  %v771_v62 = vrot.slane %v603_v43, 5  ;;  %v424_v63 = vrot.slane %v2386_v58, 2  ;;  %1519 = vmatpush3.bf16.msra.mxu1 %v1573_v38 }
 0x146   :  { %v660_v2 = vld [vmem:[%s659_s22] sm:$0x1]  ;;  %s2365_s20 = sld [smem:[#allocation4 + $0x78]]  ;;  %s695_s23 = scalar_lea.vmem [#allocation5], %s2330_s0  ;;  %v434_v4 = vsel %vm433_vm3, %v432_v53, %v415_v48  ;;  %1520 = vmatprep.subr.bf16.mxu1 %v1719_v0  ;;  %v1577_v42 = vld [vmem:[#allocation11 + $0x30] sm:$0xff]   ;;  %v1578_v43 = vld [vmem:[#allocation11 + $0x28] sm:$0xff]  }
 0x147   :  { %v664_v59 = vld [vmem:[%s663_s8] sm:$0x1]  ;;  %v678_v28 = vadd.f32 %v660_v2, %v656_v1  ;;  %s2368_s24 = sld [smem:[#allocation4 + $0x79]]  ;;  %s699_s28 = scalar_lea.vmem [#allocation5], %s2342_s18  ;;  %v643_v54 = vadd.f32 %v642_v40, %v641_v39  ;;  %v436_v14 = vsel %vm435_vm4, %v434_v4, %v418_v52  ;;  %v1574_v39 = vld [vmem:[#allocation10 + $0x8] sm:$0xff]  }
 0x148   :  { %v668_v7 = vld [vmem:[%s667_s25] sm:$0x1]  ;;  %s2377_s3 = sld [smem:[#allocation4 + $0x7a]]  ;;  %s703_s14 = scalar_lea.vmem [#allocation5], %s2349_s12  ;;  %v1582_v52 = vld [vmem:[#allocation11 + $0x8] sm:$0xff]  }
 0x149   :  { %v672_v12 = vld [vmem:[%s671_s5] sm:$0x1]  ;;  %v679_v29 = vadd.f32 %v668_v7, %v664_v59  ;;  %s2384_s19 = sld [smem:[#allocation4 + $0x7b]]  ;;  %v681_v21 = vadd.f32 %v678_v28, %v677_v27  ;;  %s707_s2 = scalar_lea.vmem [#allocation5], %s2354_s15  ;;  %v786_v59 = vsel %vm431_vm2, %v785_v51, %v768_v22  ;;  %v774_v8 = vrot.slane %v643_v54, 4  ;;  %1521 = vmatpush3.bf16.msra.mxu1 %v1574_v39  ;;  %v1581_v51 = vld [vmem:[#allocation11 + $0x10] sm:$0xff]  }
 0x14a   :  { %v676_v17 = vld [vmem:[%s675_s7] sm:$0x1]  ;;  %s2389_s1 = sld [smem:[#allocation4 + $0x7c]]  ;;  %s711_s29 = scalar_lea.vmem [#allocation5], %s2357_s26  ;;  %v787_v13 = vsel %vm433_vm3, %v786_v59, %v771_v62  ;;  %1522 = vmatprep.subr.bf16.mxu1 %v1719_v0 }
 0x14b   :  { %v688_v26 = vld [vmem:[%s687_s10] sm:$0x1]  ;;  %v680_v30 = vadd.f32 %v676_v17, %v672_v12  ;;  %s2394_s30 = sld [smem:[#allocation4 + $0x7d]]  ;;  %s715_s11 = scalar_lea.vmem [#allocation5], %s2362_s27  ;;  %v788_v25 = vsel %vm435_vm4, %v787_v13, %v774_v8 }
 0x14c   :  { %v692_v31 = vld [vmem:[%s691_s13] sm:$0x1]  ;;  %s2401_s4 = sld [smem:[#allocation4 + $0x7e]]  ;;  %s727_s17 = scalar_lea.vmem [#allocation5], %s2365_s20 }
 0x14d   :  { %v696_v35 = vld [vmem:[%s695_s23] sm:$0x1]  ;;  %v717_v45 = vadd.f32 %v692_v31, %v688_v26  ;;  %v682_v46 = vadd.f32 %v680_v30, %v679_v29  ;;  %s2404_s9 = sld [smem:[#allocation4 + $0x7f]]  ;;  %s731_s0 = scalar_lea.vmem [#allocation5], %s2368_s24  ;;  %v438_v26 = vsel %vm437_vm5, %v436_v14, %v421_v60 }
 0x14e   :  { %v700_v41 = vld [vmem:[%s699_s28] sm:$0x1]  ;;  %s735_s16 = scalar_lea.vmem [#allocation5], %s2377_s3  ;;  %v440_v31 = vsel %vm439_vm6, %v438_v26, %v424_v63  ;;  %s2605_s5 = sld [smem:[#allocation81_spill]] }
 0x14f   :  { %v704_v44 = vld [vmem:[%s703_s14] sm:$0x1]  ;;  %v718_v20 = vadd.f32 %v700_v41, %v696_v35  ;;  %v683_v1 = vadd.f32 %v682_v46, %v681_v21  ;;  %s739_s21 = scalar_lea.vmem [#allocation5], %s2384_s19  ;;  %v442_v34 = vsel %vm441_vm7, %v440_v31, %v427_v3  ;;  %v1576_v41 = vld [vmem:[#allocation11 + $0x38] sm:$0xff]   ;;  %s2606_s26 = sld [smem:[#allocation82_spill]] }
 0x150   :  { %v708_v47 = vld [vmem:[%s707_s2] sm:$0x1]  ;;  %s743_s6 = scalar_lea.vmem [#allocation5], %s2389_s1  ;;  %s2607_s13 = sld [smem:[#allocation83_spill]] }
 0x151   :  { %v712_v49 = vld [vmem:[%s711_s29] sm:$0x1]  ;;  %v719_v50 = vadd.f32 %v708_v47, %v704_v44  ;;  %v721_v57 = vadd.f32 %v718_v20, %v717_v45  ;;  %s747_s22 = scalar_lea.vmem [#allocation5], %s2394_s30  ;;  %v777_v16 = vrot.slane %v683_v1, 3  ;;  %v1580_v45 = vld [vmem:[#allocation11 + $0x18] sm:$0xff]   ;;  %s1721_s20 = smov [#allocation13]  }
 0x152   :  { %v716_v55 = vld [vmem:[%s715_s11] sm:$0x1]  ;;  %s751_s8 = scalar_lea.vmem [#allocation5], %s2401_s4  ;;  %s1165_s23 = sshll.u32 %s1721_s20, 4  ;;  %s1166_s23 = int_to_ptr.vmem [resolvable:$true] %s1165_s23 }
 0x153   :  { %v720_v56 = vadd.f32 %v716_v55, %v712_v49  ;;  %v728_v61 = vld [vmem:[%s727_s17] sm:$0x1]  ;;  %s755_s18 = scalar_lea.vmem [#allocation5], %s2404_s9  ;;  %v789_v30 = vsel %vm437_vm5, %v788_v25, %v777_v16  ;;  %s1680_s24 = scalar_lea.vmem %s1166_s23, 256 }
 0x154   :  { %v732_v2 = vld [vmem:[%s731_s0] sm:$0x1]  ;;  %p1681_p6 = scmp.ne.s32.totalorder %s1166_s23, %s1680_s24  ;;  %p1685_p7 = scmp.lt.s32.totalorder %s1166_s23, %s1166_s23 }
 0x155   :  { %v722_v5 = vadd.f32 %v720_v56, %v719_v50  ;;  %v736_v6 = vld [vmem:[%s735_s16] sm:$0x1]  ;;  %v757_v11 = vadd.f32 %v732_v2, %v728_v61  ;;  %p1686_p8 = scmp.lt.s32.totalorder %s1680_s24, %s1680_s24 }
 0x156   :  { %v740_v7 = vld [vmem:[%s739_s21] sm:$0x1] }
 0x157   :  { %v723_v9 = vadd.f32 %v722_v5, %v721_v57  ;;  %v744_v10 = vld [vmem:[%s743_s6] sm:$0x1]  ;;  %v758_v12 = vadd.f32 %v740_v7, %v736_v6  ;;  %p1687_p9 = por %p1686_p8, %p1685_p7 }
 0x158   :  { %v748_v15 = vld [vmem:[%s747_s22] sm:$0x1] }
 0x159   :  { %v752_v17 = vld [vmem:[%s751_s8] sm:$0x1]  ;;  %v759_v18 = vadd.f32 %v748_v15, %v744_v10  ;;  %v780_v19 = vrot.slane %v723_v9, 2  ;;  %v761_v28 = vadd.f32 %v758_v12, %v757_v11  ;;  %p1688_p10 = pnand %p1687_p9, %p1681_p6 }
 0x15a   :  { %v756_v24 = vld [vmem:[%s755_s18] sm:$0x1] }
 0x15b   :  { %v760_v27 = vadd.f32 %v756_v24, %v752_v17  ;;  %v790_v33 = vsel %vm439_vm6, %v789_v30, %v780_v19  ;;  %v1575_v40 = vld [vmem:[#allocation10] sm:$0xff]  }
 0x15c   :  { %1523 = vmatpush3.bf16.msra.mxu1 %v1575_v40  ;;  %v1579_v44 = vld [vmem:[#allocation11 + $0x20] sm:$0xff]  }
 0x15d   :  { %v762_v29 = vadd.f32 %v760_v27, %v759_v18  ;;  %v1434_v20 = vld [vmem:[%s2605_s5] ss:$0 sm:$0xff] }
 0x15e   :  { %v1583_v53 = vld [vmem:[#allocation11] sm:$0xff]  }
 0x15f   :  { %v763_v32 = vadd.f32 %v762_v29, %v761_v28  ;;  %v1443_v54 = vld [vmem:[%s2606_s26] ss:$0 sm:$0xff] }
 0x161   :  { %v783_v35 = vrot.slane %v763_v32, 1 }
 0x163   :  { %v791_v36 = vsel %vm441_vm7, %v790_v33, %v783_v35 }
 0x164   :  { %v812_v37 = vpack.c.bf16 %v791_v36, %v442_v34 }
 0x166   :  { %1505 = vmatmul.mubr.bf16.vlgmr.msra.gmra.mxu0 %v812_v37 }
 0x167   :  { %1544 = vmatprep.mubr.msk.bf16.mxu0 %vm1720_vm0, %v1719_v0  ;;  %1529 = vmatpush3.bf16.msra.mxu0 %v1576_v41 }
 0x168   :  { %1530 = vmatprep.subr.bf16.mxu0 %v1719_v0 }
 0x16b   :  { %1531 = vmatpush3.bf16.msra.mxu0 %v1577_v42 }
 0x16c   :  { %1532 = vmatprep.subr.bf16.mxu0 %v1719_v0 }
 0x16f   :  { %1533 = vmatpush3.bf16.msra.mxu0 %v1578_v43 }
 0x170   :  { %1534 = vmatprep.subr.bf16.mxu0 %v1719_v0 }
 0x173   :  { %1535 = vmatpush3.bf16.msra.mxu0 %v1579_v44 }
 0x174   :  { %1536 = vmatprep.subr.bf16.mxu0 %v1719_v0 }
 0x177   :  { %1537 = vmatpush3.bf16.msra.mxu0 %v1580_v45 }
 0x178   :  { %1538 = vmatprep.subr.bf16.mxu0 %v1719_v0 }
 0x17b   :  { %1539 = vmatpush3.bf16.msra.mxu0 %v1581_v51 }
 0x17c   :  { %1540 = vmatprep.subr.bf16.mxu0 %v1719_v0 }
 0x17f   :  { %1541 = vmatpush3.bf16.msra.mxu0 %v1582_v52 }
 0x180   :  { %1542 = vmatprep.subr.bf16.mxu0 %v1719_v0  ;;  %v1452_v0 = vld [vmem:[%s2607_s13] ss:$0 sm:$0xff] }
 0x183   :  { %1543 = vmatpush3.bf16.msra.mxu0 %v1583_v53 }
 0x226   :  { %v901_v58 = vpop.f32.mrf.mxu0 }
 0x227   :  { %v902_v46 = vadd.f32 %v1434_v20, %v901_v58 }
 0x228   :  { %v1506_v21 = vpop.f32.mrf.mxu0 }
 0x229   :  { %v908_v48 = vmax.f32 %v902_v46, 0.0 }
 0x22a   :  { %v904_v47 = vpop.f32.mrf.mxu0 }
 0x22b   :  { %v905_v22 = vadd.f32 %v1434_v20, %v904_v47 }
 0x22c   :  { %v1507_v23 = vpop.f32.mrf.mxu0 }
 0x22d   :  { %v909_v49 = vmax.f32 %v905_v22, 0.0 }
 0x22f   :  { %v927_v50 = vpack.c.bf16 %v909_v49, %v908_v48 }
 0x231   :  { %1525 = vmatmul.mubr.bf16.vlgmr.msra.gmra.mxu1 %v927_v50 }
 0x2f1   :  { %v1016_v55 = vpop.f32.mrf.mxu1 }
 0x2f2   :  { %v1017_v56 = vadd.f32 %v1443_v54, %v1016_v55 }
 0x2f3   :  { %v1526_v60 = vpop.f32.mrf.mxu1 }
 0x2f4   :  { %v1023_v1 = vmax.f32 %v1017_v56, 0.0 }
 0x2f5   :  { %v1019_v57 = vpop.f32.mrf.mxu1 }
 0x2f6   :  { %v1020_v62 = vadd.f32 %v1443_v54, %v1019_v57 }
 0x2f7   :  { %v1527_v63 = vpop.f32.mrf.mxu1 }
 0x2f8   :  { %v1024_v61 = vmax.f32 %v1020_v62, 0.0 }
 0x2fa   :  { %v1042_v2 = vpack.c.bf16 %v1024_v61, %v1023_v1 }
 0x2fc   :  { %1545 = vmatmul.mubr.bf16.vlgmr.msra.gmra.mxu0 %v1042_v2 }
 0x3bc   :  { %v1131_v59 = vpop.f32.mrf.mxu0 }
 0x3bd   :  { %v1132_v3 = vadd.f32 %v1452_v0, %v1131_v59 }
 0x3be   :  { %v1546_v4 = vpop.f32.mrf.mxu0 }
 0x3bf   :  { %1138 = vmax.xlane.f32.xlu0 %v1132_v3 }
 0x3c0   :  { %v1134_v5 = vpop.f32.mrf.mxu0 }
 0x3c1   :  { %v1135_v6 = vadd.f32 %v1452_v0, %v1134_v5 }
 0x3c2   :  { %v1547_v7 = vpop.f32.mrf.mxu0 }
 0x3c3   :  { %1140 = vmax.xlane.f32.xlu0 %v1135_v6 }
 0x448   :  { %v1139_v8 = vpop.xlane.xlu0 %1138 }
 0x449   :  { %v1142_v9 = vsub.f32 %v1132_v3, %v1139_v8 }
 0x44b   :  { %v1144_v10 = vmul.f32 1.442695, %v1142_v9 }
 0x44c   :  { %v1141_v11 = vpop.xlane.xlu0 %1140 }
 0x44d   :  { %v1143_v12 = vsub.f32 %v1135_v6, %v1141_v11  ;;  %1584 = vpow2.f32 %v1144_v10 }
 0x44f   :  { %v1146_v13 = vmul.f32 1.442695, %v1143_v12 }
 0x451   :  { %1586 = vpow2.f32 %v1146_v13 }
 0x45a   :  { %v1585_v14 = vpop.eup %1584 }
 0x45b   :  { %1148 = vadd.xlane.f32.xlu1 %v1585_v14 }
 0x45e   :  { %v1587_v15 = vpop.eup %1586 }
 0x45f   :  { %1150 = vadd.xlane.f32.xlu1 %v1587_v15 }
 0x4e4   :  { %v1149_v16 = vpop.xlane.xlu1 %1148 }
 0x4e5   :  { %1588 = vlog2.f32 %v1149_v16 }
 0x4e8   :  { %v1151_v17 = vpop.xlane.xlu1 %1150 }
 0x4e9   :  { %1590 = vlog2.f32 %v1151_v17 }
 0x4f2   :  { %v1589_v18 = vpop.eup %1588 }
 0x4f3   :  { %v1153_v19 = vmul.f32 0.6931472, %v1589_v18 }
 0x4f5   :  { %v1156_v24 = vsub.f32 %v1142_v9, %v1153_v19 }
 0x4f6   :  { %v1591_v25 = vpop.eup %1590 }
 0x4f7   :  { %v1155_v26 = vmul.f32 0.6931472, %v1591_v25  ;;  %1158 = vst [vmem:[#allocation13] sm:$0xff] %v1156_v24 }
 0x4f9   :  { %v1157_v27 = vsub.f32 %v1143_v12, %v1155_v26 }
 0x4fb   :  { %1159 = vst [vmem:[#allocation13 + $0x8] sm:$0xff] %v1157_v27 }
 0x4fc   :  { %1691 = shalt.err (!%p1688_p10)
}
 0x4fd   :  { %s2608_s28 = smov 8   ;;  %s2609_s3 = smov 128  }
 0x4fe   :  { %s2610_s2 = sld [smem:[#allocation84_spill]] }
 0x504   :  { %1171 = dma.vmem_to_hbm [thread:$0]  %s1166_s23, 256, %s2610_s2, [#allocation7], %s2609_s3, %s2609_s3, %s2608_s28  }
 0x505   :  { %1708 = dma.done.wait [#allocation7], 256  }
 0x506   :  { %1709 = vsyncadd [#allocation7], 4294967040 }
 0x507   :  { %1175 = vsyncpa [#allocation6], 1 }
 0x508   :  { %1176 = vsyncpa [#allocation9], 1 }
 0x509   :  { %1177 = vsyncpa [#allocation12], 1 }
 0x50a   :  { %1178 = vsyncpa [#allocation7], 1 }

</bundles_post_ra>
